<compile_context>
chip_gen: v7x
topology: tpu7x:2x2x1
jax: 0.10.0
libtpu: 0.0.40
codegen_flags: <defaults>
</compile_context>

<pallas_src>
import jax
import jax.numpy as jnp
from jax.experimental import pallas as pl
from jax.experimental.pallas import tpu as pltpu

EMB_DIM = 512  # ArcFace embedding dimension
EPS = 1e-12


def id_loss_kernel(x_ref, y_ref, w_ref, o_ref, acc_x_ref, acc_y_ref):
    # x_ref, y_ref : (N, tk) bf16      -- flattened image slabs
    # w_ref        : (tk, 512) bf16    -- streamed weight slab (the big DMA)
    # o_ref        : (N, 1) f32
    # acc_*_ref    : (N, 512) f32 VMEM scratch, persists across the K axis
    kk = pl.program_id(0)

    @pl.when(kk == 0)
    def _init():
        acc_x_ref[...] = jnp.zeros_like(acc_x_ref)
        acc_y_ref[...] = jnp.zeros_like(acc_y_ref)

    # One weight block resident in VMEM, reused by both matmuls.
    w_blk = w_ref[...]
    acc_x_ref[...] += jnp.dot(
        x_ref[...], w_blk, preferred_element_type=jnp.float32
    )
    acc_y_ref[...] += jnp.dot(
        y_ref[...], w_blk, preferred_element_type=jnp.float32
    )

    @pl.when(kk == pl.num_programs(0) - 1)
    def _finalize():
        xf = acc_x_ref[...]
        yf = acc_y_ref[...]
        # Fused normalize + cosine: 1 - <x,y> / (|x| * |y|)
        dot = jnp.sum(xf * yf, axis=-1, keepdims=True)
        nx = jnp.sum(xf * xf, axis=-1, keepdims=True)
        ny = jnp.sum(yf * yf, axis=-1, keepdims=True)
        o_ref[...] = 1.0 - dot * jax.lax.rsqrt((nx + EPS) * (ny + EPS))


def _pick_tk(k, n, vmem_budget_bytes=24 * 1024 * 1024):
    """Largest K-tile fitting the VMEM budget; prefer exact divisors of K."""
    # Per unit of tk (double-buffered): w slab (512 * bf16 * 2 buffers)
    # plus x and y slabs (n * bf16 * 2 buffers each).
    per_tk = EMB_DIM * 2 * 2 + 2 * (n * 2 * 2)
    tk_cap = max(128, (vmem_budget_bytes // per_tk) // 128 * 128)
    if k <= tk_cap:
        return k  # single step; full-extent block is always legal
    best = 0
    for tk in range(128, tk_cap + 1, 128):
        if k % tk == 0:
            best = tk
    if best:
        return best
    # No multiple-of-128 divisor fits -> fall back to padding (rare; costs an
    # HBM copy of w, acceptable only for odd K).
    return tk_cap


def id_loss(x_nchw, y_nchw, w_bf16):
    """x_nchw, y_nchw: (N, C, H, W).  w_bf16: (C*H*W, 512), ideally bf16
    pre-materialized by the caller (cast hoisted out of the per-call path)."""
    n = x_nchw.shape[0]
    k = x_nchw.shape[1] * x_nchw.shape[2] * x_nchw.shape[3]

    x2 = x_nchw.reshape(n, k).astype(jnp.bfloat16)
    y2 = y_nchw.reshape(n, k).astype(jnp.bfloat16)
    w_b = w_bf16 if w_bf16.dtype == jnp.bfloat16 else w_bf16.astype(jnp.bfloat16)

    tk = _pick_tk(k, n)
    k_pad = pl.cdiv(k, tk) * tk
    if k_pad != k:
        # Fallback only (no multiple-of-128 divisor of K fit the budget);
        # zero padding contributes 0 to the matmul.
        x2 = jnp.pad(x2, ((0, 0), (0, k_pad - k)))
        y2 = jnp.pad(y2, ((0, 0), (0, k_pad - k)))
        w_b = jnp.pad(w_b, ((0, k_pad - k), (0, 0)))
    n_k = k_pad // tk

    # Raise the scoped-VMEM limit so the chosen tile double-buffers even on
    # v5e's 16 MiB default; stays well under 64 MiB physical on v7x.
    vmem_needed = (
        2 * tk * EMB_DIM * 2          # w, double-buffered
        + 2 * 2 * n * tk * 2          # x and y slabs, double-buffered
        + 2 * n * EMB_DIM * 4         # f32 accumulators
        + n * 4                       # output
    )
    vmem_limit = int(min(max(vmem_needed + (4 << 20), 16 << 20), 48 << 20))

    cost = pl.CostEstimate(
        flops=2 * (2 * n) * k_pad * EMB_DIM,
        transcendentals=n,
        bytes_accessed=x2.size * 2 + y2.size * 2 + w_b.size * 2 + n * 4,
    )

    return pl.pallas_call(
        id_loss_kernel,
        out_shape=jax.ShapeDtypeStruct((n, 1), jnp.float32),
        grid_spec=pltpu.PrefetchScalarGridSpec(
            num_scalar_prefetch=0,
            grid=(n_k,),
            in_specs=[
                pl.BlockSpec((n, tk), lambda kk: (0, kk)),
                pl.BlockSpec((n, tk), lambda kk: (0, kk)),
                pl.BlockSpec((tk, EMB_DIM), lambda kk: (kk, 0)),
            ],
            out_specs=pl.BlockSpec((n, 1), lambda kk: (0, 0)),
            scratch_shapes=[
                pltpu.VMEM((n, EMB_DIM), jnp.float32),
                pltpu.VMEM((n, EMB_DIM), jnp.float32),
            ],
        ),
        compiler_params=pltpu.CompilerParams(
            dimension_semantics=("arbitrary",),  # K is a reduction axis
            vmem_limit_bytes=vmem_limit,
        ),
        cost_estimate=cost,
    )(x2, y2, w_b)


def id_loss_ref(x_nchw, y_nchw, w):
    # Mirrors the kernel's precision contract: bf16 matmul, f32 accumulation.
    n = x_nchw.shape[0]
    wb = w.astype(jnp.bfloat16)
    xf = jnp.dot(x_nchw.reshape(n, -1).astype(jnp.bfloat16), wb,
                 preferred_element_type=jnp.float32)
    yf = jnp.dot(y_nchw.reshape(n, -1).astype(jnp.bfloat16), wb,
                 preferred_element_type=jnp.float32)
    dot = jnp.sum(xf * yf, axis=-1, keepdims=True)
    nx = jnp.sum(xf * xf, axis=-1, keepdims=True)
    ny = jnp.sum(yf * yf, axis=-1, keepdims=True)
    return 1.0 - dot * jax.lax.rsqrt((nx + EPS) * (ny + EPS))


if __name__ == "__main__":
    key = jax.random.PRNGKey(0)
    kx, ky, kw = jax.random.split(key, 3)

    N, C, H, W = 2, 3, 16, 16  # small NCHW images (real model uses 3x112x112)
    K = C * H * W

    x = jax.random.normal(kx, (N, C, H, W), dtype=jnp.float32)
    y = jax.random.normal(ky, (N, C, H, W), dtype=jnp.float32)
    # Deterministic synthetic backbone weights, pre-materialized in bf16 once
    # (the cast is hoisted out of the per-call path).
    w_f32 = jax.random.normal(kw, (K, EMB_DIM), dtype=jnp.float32) * 0.02
    w_bf16 = w_f32.astype(jnp.bfloat16)

    out = jax.block_until_ready(id_loss(x, y, w_bf16))
    ref = id_loss_ref(x, y, w_f32)

    assert out.shape == (N, 1)
    assert jnp.allclose(out, ref, atol=2e-3, rtol=2e-3), (out, ref)
    print("KERNEL_OK")
</pallas_src>

<mosaic_0001>
module attributes {stable_mosaic.version = 11 : i64} {
  func.func @id_loss_kernel(%arg0: i32, %arg1: memref<2x768xbf16, #tpu.memory_space<vmem>>, %arg2: memref<2x768xbf16, #tpu.memory_space<vmem>>, %arg3: memref<768x512xbf16, #tpu.memory_space<vmem>>, %arg4: memref<2x1xf32, #tpu.memory_space<vmem>>, %arg5: memref<2x512xf32, #tpu.memory_space<vmem>>, %arg6: memref<2x512xf32, #tpu.memory_space<vmem>>) attributes {dimension_semantics = [#tpu.dimension_semantics<arbitrary>], iteration_bounds = array<i64: 1>, scalar_prefetch = 0 : i64, scratch_operands = 2 : i64, tpu.core_type = #tpu.core_type<tc>, window_params = [{transform_indices = @transform_0, window_bounds = array<i64: 2, 768>}, {transform_indices = @transform_1, window_bounds = array<i64: 2, 768>}, {transform_indices = @transform_2, window_bounds = array<i64: 768, 512>}, {pipeline_mode = #tpu.pipeline_mode<synchronous>, transform_indices = @transform_3, window_bounds = array<i64: 2, 1>}]} {
    %c0_i32 = arith.constant 0 : i32
    %0 = arith.cmpi eq, %arg0, %c0_i32 : i32
    %1 = arith.extui %0 : i1 to i32
    %c0_i32_0 = arith.constant 0 : i32
    %2 = arith.cmpi ne, %1, %c0_i32_0 : i32
    scf.if %2 {
      %cst_17 = arith.constant 0.000000e+00 : f32
      %17 = vector.broadcast %cst_17 : f32 to vector<2x512xf32>
      %c0_18 = arith.constant 0 : index
      %c0_19 = arith.constant 0 : index
      %18 = vector.load %arg5[%c0_18, %c0_19] : memref<2x512xf32, #tpu.memory_space<vmem>>, vector<2x512xf32>
      tpu.vector_store %arg5[%c0_18, %c0_19], %17 {strides = array<i32>} : memref<2x512xf32, #tpu.memory_space<vmem>>, vector<2x512xf32>,
      %cst_20 = arith.constant 0.000000e+00 : f32
      %19 = vector.broadcast %cst_20 : f32 to vector<2x512xf32>
      %c0_21 = arith.constant 0 : index
      %c0_22 = arith.constant 0 : index
      %20 = vector.load %arg6[%c0_21, %c0_22] : memref<2x512xf32, #tpu.memory_space<vmem>>, vector<2x512xf32>
      tpu.vector_store %arg6[%c0_21, %c0_22], %19 {strides = array<i32>} : memref<2x512xf32, #tpu.memory_space<vmem>>, vector<2x512xf32>,
    } else {
    }
    %c0 = arith.constant 0 : index
    %c0_1 = arith.constant 0 : index
    %3 = vector.load %arg3[%c0, %c0_1] : memref<768x512xbf16, #tpu.memory_space<vmem>>, vector<768x512xbf16>
    %c0_2 = arith.constant 0 : index
    %c0_3 = arith.constant 0 : index
    %4 = vector.load %arg5[%c0_2, %c0_3] : memref<2x512xf32, #tpu.memory_space<vmem>>, vector<2x512xf32>
    %c0_4 = arith.constant 0 : index
    %c0_5 = arith.constant 0 : index
    %5 = vector.load %arg1[%c0_4, %c0_5] : memref<2x768xbf16, #tpu.memory_space<vmem>>, vector<2x768xbf16>
    %cst = arith.constant dense<0.000000e+00> : vector<2x512xf32>
    %6 = tpu.matmul %5, %3, %cst {dimension_numbers = #tpu.dot_dimension_numbers<[1], [0], [0], [1], [0, 0, 1, 1], [], []>} : vector<2x768xbf16>, vector<768x512xbf16>, vector<2x512xf32> -> vector<2x512xf32>
    %7 = arith.addf %4, %6 : vector<2x512xf32>
    %c0_6 = arith.constant 0 : index
    %c0_7 = arith.constant 0 : index
    %8 = vector.load %arg5[%c0_6, %c0_7] : memref<2x512xf32, #tpu.memory_space<vmem>>, vector<2x512xf32>
    tpu.vector_store %arg5[%c0_6, %c0_7], %7 {strides = array<i32>} : memref<2x512xf32, #tpu.memory_space<vmem>>, vector<2x512xf32>,
    %c0_8 = arith.constant 0 : index
    %c0_9 = arith.constant 0 : index
    %9 = vector.load %arg6[%c0_8, %c0_9] : memref<2x512xf32, #tpu.memory_space<vmem>>, vector<2x512xf32>
    %c0_10 = arith.constant 0 : index
    %c0_11 = arith.constant 0 : index
    %10 = vector.load %arg2[%c0_10, %c0_11] : memref<2x768xbf16, #tpu.memory_space<vmem>>, vector<2x768xbf16>
    %cst_12 = arith.constant dense<0.000000e+00> : vector<2x512xf32>
    %11 = tpu.matmul %10, %3, %cst_12 {dimension_numbers = #tpu.dot_dimension_numbers<[1], [0], [0], [1], [0, 0, 1, 1], [], []>} : vector<2x768xbf16>, vector<768x512xbf16>, vector<2x512xf32> -> vector<2x512xf32>
    %12 = arith.addf %9, %11 : vector<2x512xf32>
    %c0_13 = arith.constant 0 : index
    %c0_14 = arith.constant 0 : index
    %13 = vector.load %arg6[%c0_13, %c0_14] : memref<2x512xf32, #tpu.memory_space<vmem>>, vector<2x512xf32>
    tpu.vector_store %arg6[%c0_13, %c0_14], %12 {strides = array<i32>} : memref<2x512xf32, #tpu.memory_space<vmem>>, vector<2x512xf32>,
    %c0_i32_15 = arith.constant 0 : i32
    %14 = arith.cmpi eq, %arg0, %c0_i32_15 : i32
    %15 = arith.extui %14 : i1 to i32
    %c0_i32_16 = arith.constant 0 : i32
    %16 = arith.cmpi ne, %15, %c0_i32_16 : i32
    scf.if %16 {
      %c0_17 = arith.constant 0 : index
      %c0_18 = arith.constant 0 : index
      %17 = vector.load %arg5[%c0_17, %c0_18] : memref<2x512xf32, #tpu.memory_space<vmem>>, vector<2x512xf32>
      %c0_19 = arith.constant 0 : index
      %c0_20 = arith.constant 0 : index
      %18 = vector.load %arg6[%c0_19, %c0_20] : memref<2x512xf32, #tpu.memory_space<vmem>>, vector<2x512xf32>
      %19 = arith.mulf %17, %18 : vector<2x512xf32>
      %cst_21 = arith.constant dense<0.000000e+00> : vector<2xf32>
      %20 = vector.multi_reduction <add>, %19, %cst_21 [1] : vector<2x512xf32> to vector<2xf32>
      %21 = vector.shape_cast %20 : vector<2xf32> to vector<2x1xf32>
      %22 = arith.mulf %17, %17 : vector<2x512xf32>
      %cst_22 = arith.constant dense<0.000000e+00> : vector<2xf32>
      %23 = vector.multi_reduction <add>, %22, %cst_22 [1] : vector<2x512xf32> to vector<2xf32>
      %24 = vector.shape_cast %23 : vector<2xf32> to vector<2x1xf32>
      %25 = arith.mulf %18, %18 : vector<2x512xf32>
      %cst_23 = arith.constant dense<0.000000e+00> : vector<2xf32>
      %26 = vector.multi_reduction <add>, %25, %cst_23 [1] : vector<2x512xf32> to vector<2xf32>
      %27 = vector.shape_cast %26 : vector<2xf32> to vector<2x1xf32>
      %cst_24 = arith.constant 9.99999996E-13 : f32
      %28 = vector.broadcast %cst_24 : f32 to vector<2x1xf32>
      %29 = arith.addf %24, %28 : vector<2x1xf32>
      %cst_25 = arith.constant 9.99999996E-13 : f32
      %30 = vector.broadcast %cst_25 : f32 to vector<2x1xf32>
      %31 = arith.addf %27, %30 : vector<2x1xf32>
      %32 = arith.mulf %29, %31 : vector<2x1xf32>
      %33 = math.rsqrt %32 : vector<2x1xf32>
      %34 = arith.mulf %21, %33 : vector<2x1xf32>
      %cst_26 = arith.constant 1.000000e+00 : f32
      %35 = vector.broadcast %cst_26 : f32 to vector<2x1xf32>
      %36 = arith.subf %35, %34 : vector<2x1xf32>
      %c0_27 = arith.constant 0 : index
      %c0_28 = arith.constant 0 : index
      %37 = vector.load %arg4[%c0_27, %c0_28] : memref<2x1xf32, #tpu.memory_space<vmem>>, vector<2x1xf32>
      tpu.vector_store %arg4[%c0_27, %c0_28], %36 {strides = array<i32>} : memref<2x1xf32, #tpu.memory_space<vmem>>, vector<2x1xf32>,
    } else {
    }
    return
  }
  func.func @transform_0(%arg0: i32) -> (i32, i32) {
    %c0_i32 = arith.constant 0 : i32
    %c0_i32_0 = arith.constant 0 : i32
    return %c0_i32, %arg0 : i32, i32
  }
  func.func @transform_1(%arg0: i32) -> (i32, i32) {
    %c0_i32 = arith.constant 0 : i32
    %c0_i32_0 = arith.constant 0 : i32
    return %c0_i32, %arg0 : i32, i32
  }
  func.func @transform_2(%arg0: i32) -> (i32, i32) {
    %c0_i32 = arith.constant 0 : i32
    %c0_i32_0 = arith.constant 0 : i32
    return %arg0, %c0_i32 : i32, i32
  }
  func.func @transform_3(%arg0: i32) -> (i32, i32) {
    %c0_i32 = arith.constant 0 : i32
    %c0_i32_0 = arith.constant 0 : i32
    %c0_i32_1 = arith.constant 0 : i32
    return %c0_i32, %c0_i32_0 : i32, i32
  }
}

</mosaic_0001>

<bundles_post_ra>
// kernel: tpu_custom_call.1
= control target key start
LH: loop header
LB: loop body
LE: loop exit
PB: predicated region body
PF: predicated region fallthrough
CT: control target
= control target key end

     0   :  { %8 = vsyncpa [#allocation5], 0  ;;  %s3351_s0 = inlined_call_operand.hbm [shape: bf16[2,768], index: 0, kind: input, shape index: {}]   ;;  %s3352_s1 = inlined_call_operand.hbm [shape: bf16[2,768], index: 1, kind: input, shape index: {}]   ;;  %s3353_s2 = inlined_call_operand.hbm [shape: bf16[768,512], index: 2, kind: input, shape index: {}]   ;;  %s3354_s3 = inlined_call_operand.vmem [shape: f32[2,1], index: 3, kind: output, shape index: {}]  }
   0x1   :  { %9 = vsyncpa [#allocation7], 0  ;;  %s2612_s12 = smov [#allocation6]   ;;  %s2613_s14 = smov [#allocation4]  }
   0x2   :  { %s26_s13 = sshll.u32 %s2612_s12, 4  ;;  %s16_s15 = sshll.u32 %s2613_s14, 4  ;;  %s27_s13 = int_to_ptr.vmem [resolvable:$true] %s26_s13  ;;  %s17_s15 = int_to_ptr.vmem [resolvable:$true] %s16_s15 }
   0x3   :  { %s2542_s18 = scalar_lea.hbm %s3352_s1, 96 }
   0x4   :  { %p2543_p0 = scmp.ne.s32.totalorder %s3352_s1, %s2542_s18  ;;  %p2546_p1 = scmp.lt.u32.totalorder %s2542_s18, %s3352_s1 }
   0x6   :  { %p2548_p2 = pnand %p2546_p1, %p2543_p0 }
   0x8   :  { %2551 = shalt.err (!%p2548_p2)
}
   0x9   :  { %s2552_s23 = scalar_lea.vmem %s27_s13, 96  ;;  %p2557_p4 = scmp.lt.s32.totalorder %s27_s13, %s27_s13 }
   0xa   :  { %p2553_p3 = scmp.ne.s32.totalorder %s27_s13, %s2552_s23  ;;  %p2558_p5 = scmp.lt.s32.totalorder %s2552_s23, %s2552_s23 }
   0xc   :  { %p2559_p6 = por %p2558_p5, %p2557_p4 }
   0xe   :  { %p2560_p7 = pnand %p2559_p6, %p2553_p3 }
  0x10   :  { %2563 = shalt.err (!%p2560_p7)
}
  0x11   :  { %29 = dma.hbm_to_vmem [thread:$0]  %s3352_s1, 96, %s27_s13, [#allocation7]  }
  0x12   :  { %s2564_s28 = scalar_lea.hbm %s3351_s0, 96 }
  0x13   :  { %p2565_p8 = scmp.ne.s32.totalorder %s3351_s0, %s2564_s28  ;;  %p2568_p9 = scmp.lt.u32.totalorder %s2564_s28, %s3351_s0 }
  0x15   :  { %p2570_p10 = pnand %p2568_p9, %p2565_p8 }
  0x17   :  { %2573 = shalt.err (!%p2570_p10)
}
  0x18   :  { %s2574_s6 = scalar_lea.vmem %s17_s15, 96  ;;  %p2579_p12 = scmp.lt.s32.totalorder %s17_s15, %s17_s15 }
  0x19   :  { %p2575_p11 = scmp.ne.s32.totalorder %s17_s15, %s2574_s6  ;;  %p2580_p13 = scmp.lt.s32.totalorder %s2574_s6, %s2574_s6 }
  0x1b   :  { %p2581_p0 = por %p2580_p13, %p2579_p12 }
  0x1d   :  { %p2582_p1 = pnand %p2581_p0, %p2575_p11 }
  0x1f   :  { %2585 = shalt.err (!%p2582_p1)
}
  0x20   :  { %19 = dma.hbm_to_vmem [thread:$0]  %s3351_s0, 96, %s17_s15, [#allocation5]  }
  0x21   :  { %s2614_s8 = smov [#allocation8]   ;;  %s2586_s12 = scalar_lea.hbm %s3353_s2, 24576 }
  0x22   :  { %s35_s9 = sshll.u32 %s2614_s8, 4  ;;  %p2587_p2 = scmp.ne.s32.totalorder %s3353_s2, %s2586_s12  ;;  %s36_s9 = int_to_ptr.vmem [resolvable:$true] %s35_s9 }
  0x23   :  { %p2590_p3 = scmp.lt.u32.totalorder %s2586_s12, %s3353_s2 }
  0x25   :  { %p2592_p4 = pnand %p2590_p3, %p2587_p2 }
  0x27   :  { %2595 = shalt.err (!%p2592_p4)
}
  0x28   :  { %s2596_s18 = scalar_lea.vmem %s36_s9, 24576  ;;  %p2601_p6 = scmp.lt.s32.totalorder %s36_s9, %s36_s9 }
  0x29   :  { %p2597_p5 = scmp.ne.s32.totalorder %s36_s9, %s2596_s18  ;;  %p2602_p7 = scmp.lt.s32.totalorder %s2596_s18, %s2596_s18 }
  0x2b   :  { %p2603_p8 = por %p2602_p7, %p2601_p6 }
  0x2d   :  { %p2604_p9 = pnand %p2603_p8, %p2597_p5 }
  0x2f   :  { %2607 = shalt.err (!%p2604_p9)
}
  0x30   :  { %s2615_s0 = smov 256   ;;  %s2616_s15 = smov 16  }
  0x31   :  { %41 = dma.hbm_to_vmem [thread:$0]  %s3353_s2, 24576, %s36_s9, [#allocation7], %s2615_s0, %s2615_s0, %s2616_s15  }
  0x32   :  { %2608 = dma.done.wait [#allocation5], 96  }
  0x33   :  { %2609 = vsyncadd [#allocation5], 4294967200 }
  0x34   :  { %2610 = dma.done.wait [#allocation7], 24672  }
  0x35   :  { %2611 = vsyncadd [#allocation7], 4294942624  ;;  %v2208_v0 = vld [vmem:[#allocation8 + $0x4] ss:$16 sps:$4 sm:$0xff]   ;;  %v2210_v1 = vld [vmem:[#allocation8 + $0xc] ss:$16 sps:$4 sm:$0xff]   ;;  %v256_v38 = vlaneseq }
  0x36   :  { %1265 = vmatprep.subr.bf16.mxu0 %v2208_v0  ;;  %v2212_v2 = vld [vmem:[#allocation8] ss:$16 sps:$4 sm:$0xff]   ;;  %v2213_v3 = vld [vmem:[#allocation8 + $0x8] ss:$16 sps:$4 sm:$0xff]   ;;  %1388 = vmatprep.subr.bf16.mxu1 %v2210_v1  ;;  %v2214_v4 = vld [vmem:[#allocation8 + $0x24] ss:$16 sps:$4 sm:$0xff]  }
  0x37   :  { %1266 = vmatpush1.bf16.msra.mxu0 %v2212_v2  ;;  %1389 = vmatpush1.bf16.msra.mxu1 %v2213_v3  ;;  %v2216_v5 = vld [vmem:[#allocation8 + $0x2c] ss:$16 sps:$4 sm:$0xff]   ;;  %v2218_v6 = vld [vmem:[#allocation8 + $0x20] ss:$16 sps:$4 sm:$0xff]   ;;  %v2219_v7 = vld [vmem:[#allocation8 + $0x28] ss:$16 sps:$4 sm:$0xff]  }
  0x38   :  { %1267 = vmatprep.subr.bf16.mxu0 %v2214_v4  ;;  %1390 = vmatprep.subr.bf16.mxu1 %v2216_v5  ;;  %v2220_v8 = vld [vmem:[#allocation8 + $0x44] ss:$16 sps:$4 sm:$0xff]   ;;  %v2222_v9 = vld [vmem:[#allocation8 + $0x4c] ss:$16 sps:$4 sm:$0xff]   ;;  %v2224_v10 = vld [vmem:[#allocation8 + $0x40] ss:$16 sps:$4 sm:$0xff]  }
  0x39   :  { %v2225_v11 = vld [vmem:[#allocation8 + $0x48] ss:$16 sps:$4 sm:$0xff]   ;;  %v2226_v12 = vld [vmem:[#allocation8 + $0x64] ss:$16 sps:$4 sm:$0xff]   ;;  %v2228_v13 = vld [vmem:[#allocation8 + $0x6c] ss:$16 sps:$4 sm:$0xff]  }
  0x3a   :  { %v2230_v14 = vld [vmem:[#allocation8 + $0x60] ss:$16 sps:$4 sm:$0xff]   ;;  %v2231_v15 = vld [vmem:[#allocation8 + $0x68] ss:$16 sps:$4 sm:$0xff]   ;;  %v2232_v16 = vld [vmem:[#allocation8 + $0x84] ss:$16 sps:$4 sm:$0xff]  }
  0x3b   :  { %1268 = vmatpush1.bf16.msra.mxu0 %v2218_v6  ;;  %1391 = vmatpush1.bf16.msra.mxu1 %v2219_v7  ;;  %v2234_v17 = vld [vmem:[#allocation8 + $0x8c] ss:$16 sps:$4 sm:$0xff]   ;;  %v2236_v18 = vld [vmem:[#allocation8 + $0x80] ss:$16 sps:$4 sm:$0xff]   ;;  %v2237_v19 = vld [vmem:[#allocation8 + $0x88] ss:$16 sps:$4 sm:$0xff]  }
  0x3c   :  { %1269 = vmatprep.subr.bf16.mxu0 %v2220_v8  ;;  %1392 = vmatprep.subr.bf16.mxu1 %v2222_v9  ;;  %v2238_v20 = vld [vmem:[#allocation8 + $0xa4] ss:$16 sps:$4 sm:$0xff]   ;;  %v2240_v21 = vld [vmem:[#allocation8 + $0xac] ss:$16 sps:$4 sm:$0xff]   ;;  %v2242_v22 = vld [vmem:[#allocation8 + $0xa0] ss:$16 sps:$4 sm:$0xff]  }
  0x3d   :  { %v2243_v23 = vld [vmem:[#allocation8 + $0xa8] ss:$16 sps:$4 sm:$0xff]   ;;  %v2244_v24 = vld [vmem:[#allocation8 + $0xc4] ss:$16 sps:$4 sm:$0xff]   ;;  %v2246_v25 = vld [vmem:[#allocation8 + $0xcc] ss:$16 sps:$4 sm:$0xff]  }
  0x3e   :  { %v2248_v26 = vld [vmem:[#allocation8 + $0xc0] ss:$16 sps:$4 sm:$0xff]   ;;  %v2249_v27 = vld [vmem:[#allocation8 + $0xc8] ss:$16 sps:$4 sm:$0xff]   ;;  %v2250_v28 = vld [vmem:[#allocation8 + $0xe4] ss:$16 sps:$4 sm:$0xff]  }
  0x3f   :  { %1270 = vmatpush1.bf16.msra.mxu0 %v2224_v10  ;;  %1393 = vmatpush1.bf16.msra.mxu1 %v2225_v11  ;;  %v2252_v29 = vld [vmem:[#allocation8 + $0xec] ss:$16 sps:$4 sm:$0xff]   ;;  %v2254_v30 = vld [vmem:[#allocation8 + $0xe0] ss:$16 sps:$4 sm:$0xff]   ;;  %v2255_v31 = vld [vmem:[#allocation8 + $0xe8] ss:$16 sps:$4 sm:$0xff]  }
  0x40   :  { %1271 = vmatprep.subr.bf16.mxu0 %v2226_v12  ;;  %1394 = vmatprep.subr.bf16.mxu1 %v2228_v13  ;;  %v2256_v32 = vld [vmem:[#allocation8 + $0x104] ss:$16 sps:$4 sm:$0xff]   ;;  %v2258_v33 = vld [vmem:[#allocation8 + $0x10c] ss:$16 sps:$4 sm:$0xff]   ;;  %v2260_v34 = vld [vmem:[#allocation8 + $0x100] ss:$16 sps:$4 sm:$0xff]  }
  0x41   :  { %v2261_v35 = vld [vmem:[#allocation8 + $0x108] ss:$16 sps:$4 sm:$0xff]   ;;  %v2617_v36 = vmov 1966171168   ;;  %v2262_v39 = vld [vmem:[#allocation8 + $0x124] ss:$16 sps:$4 sm:$0xff]  }
  0x42   :  { %v254_v37 = vunpack.c.l.s4 %v2617_v36  ;;  %v2264_v40 = vld [vmem:[#allocation8 + $0x12c] ss:$16 sps:$4 sm:$0xff]   ;;  %v2266_v41 = vld [vmem:[#allocation8 + $0x120] ss:$16 sps:$4 sm:$0xff]   ;;  %v2675_v43 = vshrl.u32 %v256_v38, 7  ;;  %vm1889_vm0 = vcmask 1041408  }
  0x43   :  { %1272 = vmatpush1.bf16.msra.mxu0 %v2230_v14  ;;  %1395 = vmatpush1.bf16.msra.mxu1 %v2231_v15  ;;  %v2267_v44 = vld [vmem:[#allocation8 + $0x128] ss:$16 sps:$4 sm:$0xff]   ;;  %v2268_v45 = vld [vmem:[#allocation8 + $0x144] ss:$16 sps:$4 sm:$0xff]   ;;  %v2270_v46 = vld [vmem:[#allocation8 + $0x14c] ss:$16 sps:$4 sm:$0xff]  }
  0x44   :  { %1273 = vmatprep.subr.bf16.mxu0 %v2232_v16  ;;  %1396 = vmatprep.subr.bf16.mxu1 %v2234_v17  ;;  %v255_v42 = vunpack.c.0.s8 %v254_v37  ;;  %3457 = vst [vmem:[#allocation11_spill] sm:$0xff] %v2675_v43  ;;  %v2677_v47 = vld [vmem:[#allocation8 + $0x140] ss:$16 sps:$4 sm:$0xff]   ;;  %v2679_v48 = vld [vmem:[#allocation8 + $0x148] ss:$16 sps:$4 sm:$0xff]   ;;  %vm1969_vm1 = vcmask 1024  }
  0x45   :  { %v2684_v50 = vld [vmem:[#allocation8 + $0x164] ss:$16 sps:$4 sm:$0xff]   ;;  %v2686_v51 = vld [vmem:[#allocation8 + $0x16c] ss:$16 sps:$4 sm:$0xff]   ;;  %v2690_v53 = vld [vmem:[#allocation8 + $0x160] ss:$16 sps:$4 sm:$0xff]  }
  0x46   :  { %v2682_v49 = vsub.s32 %v255_v42, %v2675_v43  ;;  %v2688_v52 = vld [vmem:[#allocation4] sm:$0x3f]  ;;  %v2702_v57 = vld [vmem:[#allocation8 + $0x18c] ss:$16 sps:$4 sm:$0xff]   ;;  %v2704_v59 = vld [vmem:[#allocation8 + $0x180] ss:$16 sps:$4 sm:$0xff]  }
  0x47   :  { %1274 = vmatpush1.bf16.msra.mxu0 %v2236_v18  ;;  %1397 = vmatpush1.bf16.msra.mxu1 %v2237_v19  ;;  %v2696_v55 = vld [vmem:[#allocation8 + $0x168] ss:$16 sps:$4 sm:$0xff]   ;;  %v2700_v56 = vld [vmem:[#allocation8 + $0x184] ss:$16 sps:$4 sm:$0xff]   ;;  %v2715_v63 = vld [vmem:[#allocation8 + $0x1ac] ss:$16 sps:$4 sm:$0xff]  }
  0x48   :  { %1275 = vmatprep.subr.bf16.mxu0 %v2238_v20  ;;  %1398 = vmatprep.subr.bf16.mxu1 %v2240_v21  ;;  %v259_v54 = vrot.slane %v2688_v52, %v2682_v49  ;;  %v2709_v61 = vld [vmem:[#allocation8 + $0x188] ss:$16 sps:$4 sm:$0xff]   ;;  %v2713_v62 = vld [vmem:[#allocation8 + $0x1a4] ss:$16 sps:$4 sm:$0xff]   ;;  %v2717_v0 = vld [vmem:[#allocation8 + $0x1a0] ss:$16 sps:$4 sm:$0xff]  }
  0x49   :  { %v2721_v1 = vld [vmem:[#allocation8 + $0x1a8] ss:$16 sps:$4 sm:$0xff]   ;;  %v2725_v2 = vld [vmem:[#allocation8 + $0x1c4] ss:$16 sps:$4 sm:$0xff]   ;;  %v2727_v3 = vld [vmem:[#allocation8 + $0x1cc] ss:$16 sps:$4 sm:$0xff]  }
  0x4a   :  { %v267_v58 = vcombine.high %v259_v54, %v259_v54  ;;  %v2729_v4 = vld [vmem:[#allocation8 + $0x1c0] ss:$16 sps:$4 sm:$0xff]   ;;  %v2733_v5 = vld [vmem:[#allocation8 + $0x1c8] ss:$16 sps:$4 sm:$0xff]   ;;  %v2737_v6 = vld [vmem:[#allocation8 + $0x1e4] ss:$16 sps:$4 sm:$0xff]   ;;  %v2756_v13 = vrot.slane %v259_v54, %v2682_v49 }
  0x4b   :  { %1276 = vmatpush1.bf16.msra.mxu0 %v2242_v22  ;;  %1399 = vmatpush1.bf16.msra.mxu1 %v2243_v23  ;;  %v2739_v7 = vld [vmem:[#allocation8 + $0x1ec] ss:$16 sps:$4 sm:$0xff]   ;;  %v2741_v8 = vld [vmem:[#allocation8 + $0x1e0] ss:$16 sps:$4 sm:$0xff]   ;;  %v2745_v9 = vld [vmem:[#allocation8 + $0x1e8] ss:$16 sps:$4 sm:$0xff]  }
  0x4c   :  { %1277 = vmatprep.subr.bf16.mxu0 %v2244_v24  ;;  %1400 = vmatprep.subr.bf16.mxu1 %v2246_v25  ;;  %v289_v60 = vrot.slane %v267_v58, %v2682_v49  ;;  %v2749_v10 = vld [vmem:[#allocation8 + $0x204] ss:$16 sps:$4 sm:$0xff]   ;;  %v2751_v11 = vld [vmem:[#allocation8 + $0x20c] ss:$16 sps:$4 sm:$0xff]   ;;  %v2753_v12 = vld [vmem:[#allocation8 + $0x200] ss:$16 sps:$4 sm:$0xff]  }
  0x4d   :  { %v2760_v14 = vld [vmem:[#allocation8 + $0x208] ss:$16 sps:$4 sm:$0xff]   ;;  %v2764_v15 = vld [vmem:[#allocation8 + $0x224] ss:$16 sps:$4 sm:$0xff]   ;;  %v2766_v16 = vld [vmem:[#allocation8 + $0x22c] ss:$16 sps:$4 sm:$0xff]  }
  0x4e   :  { %1297 = vmatprep.mubr.bf16.mxu0 %v289_v60  ;;  %1420 = vmatprep.mubr.bf16.mxu1 %v289_v60  ;;  %v298_v17 = vcombine.high %v289_v60, %v289_v60  ;;  %v2770_v18 = vld [vmem:[#allocation8 + $0x220] ss:$16 sps:$4 sm:$0xff]   ;;  %v2774_v19 = vld [vmem:[#allocation8 + $0x228] ss:$16 sps:$4 sm:$0xff]   ;;  %v2778_v20 = vld [vmem:[#allocation8 + $0x244] ss:$16 sps:$4 sm:$0xff]  }
  0x4f   :  { %1278 = vmatpush1.bf16.msra.mxu0 %v2248_v26  ;;  %1401 = vmatpush1.bf16.msra.mxu1 %v2249_v27  ;;  %v2780_v21 = vld [vmem:[#allocation8 + $0x24c] ss:$16 sps:$4 sm:$0xff]   ;;  %v2782_v22 = vld [vmem:[#allocation8 + $0x240] ss:$16 sps:$4 sm:$0xff]   ;;  %v2786_v23 = vld [vmem:[#allocation8 + $0x248] ss:$16 sps:$4 sm:$0xff]  }
  0x50   :  { %1279 = vmatprep.subr.bf16.mxu0 %v2250_v28  ;;  %1402 = vmatprep.subr.bf16.mxu1 %v2252_v29  ;;  %v2790_v24 = vld [vmem:[#allocation8 + $0x264] ss:$16 sps:$4 sm:$0xff]   ;;  %v2792_v25 = vld [vmem:[#allocation8 + $0x26c] ss:$16 sps:$4 sm:$0xff]   ;;  %v2794_v26 = vld [vmem:[#allocation8 + $0x260] ss:$16 sps:$4 sm:$0xff]  }
  0x51   :  { %v2798_v27 = vld [vmem:[#allocation8 + $0x268] ss:$16 sps:$4 sm:$0xff]   ;;  %v2802_v28 = vld [vmem:[#allocation8 + $0x284] ss:$16 sps:$4 sm:$0xff]   ;;  %v2804_v29 = vld [vmem:[#allocation8 + $0x28c] ss:$16 sps:$4 sm:$0xff]  }
  0x52   :  { %v2826_v36 = vld [vmem:[#allocation8 + $0x2c4] ss:$16 sps:$4 sm:$0xff]   ;;  %v2828_v37 = vld [vmem:[#allocation8 + $0x2cc] ss:$16 sps:$4 sm:$0xff]   ;;  %v2830_v38 = vld [vmem:[#allocation8 + $0x2c0] ss:$16 sps:$4 sm:$0xff]  }
  0x53   :  { %1280 = vmatpush1.bf16.msra.mxu0 %v2254_v30  ;;  %1403 = vmatpush1.bf16.msra.mxu1 %v2255_v31  ;;  %v2806_v30 = vld [vmem:[#allocation8 + $0x280] ss:$16 sps:$4 sm:$0xff]   ;;  %v2810_v31 = vld [vmem:[#allocation8 + $0x288] ss:$16 sps:$4 sm:$0xff]   ;;  %v2862_v60 = vld [vmem:[#allocation8 + $0x324] ss:$16 sps:$4 sm:$0xff]  }
  0x54   :  { %1281 = vmatprep.subr.bf16.mxu0 %v2256_v32  ;;  %1404 = vmatprep.subr.bf16.mxu1 %v2258_v33  ;;  %v2814_v32 = vld [vmem:[#allocation8 + $0x2a4] ss:$16 sps:$4 sm:$0xff]   ;;  %v2816_v33 = vld [vmem:[#allocation8 + $0x2ac] ss:$16 sps:$4 sm:$0xff]   ;;  %v2842_v42 = vld [vmem:[#allocation8 + $0x2e0] ss:$16 sps:$4 sm:$0xff]  }
  0x55   :  { %3460 = vst [vmem:[#allocation14_spill] sm:$0xff] %v2842_v42  ;;  %v2854_v54 = vld [vmem:[#allocation8 + $0x300] ss:$16 sps:$4 sm:$0xff]   ;;  %v2858_v58 = vld [vmem:[#allocation8 + $0x308] ss:$16 sps:$4 sm:$0xff]   ;;  %3466 = vst [vmem:[#allocation20_spill] sm:$0xff] %v2862_v60 }
  0x56   :  { %3464 = vst [vmem:[#allocation18_spill] sm:$0xff] %v2854_v54  ;;  %3465 = vst [vmem:[#allocation19_spill] sm:$0xff] %v2858_v58  ;;  %v2866_v43 = vld [vmem:[#allocation8 + $0x320] ss:$16 sps:$4 sm:$0xff]  }
  0x57   :  { %1282 = vmatpush1.bf16.msra.mxu0 %v2260_v34  ;;  %1405 = vmatpush1.bf16.msra.mxu1 %v2261_v35  ;;  %v2818_v34 = vld [vmem:[#allocation8 + $0x2a0] ss:$16 sps:$4 sm:$0xff]   ;;  %v2822_v35 = vld [vmem:[#allocation8 + $0x2a8] ss:$16 sps:$4 sm:$0xff]   ;;  %3468 = vst [vmem:[#allocation22_spill] sm:$0xff] %v2866_v43 }
  0x58   :  { %1283 = vmatprep.subr.bf16.mxu0 %v2262_v39  ;;  %1406 = vmatprep.subr.bf16.mxu1 %v2264_v40  ;;  %v2834_v39 = vld [vmem:[#allocation8 + $0x2c8] ss:$16 sps:$4 sm:$0xff]   ;;  %v2838_v40 = vld [vmem:[#allocation8 + $0x2e4] ss:$16 sps:$4 sm:$0xff]  }
  0x59   :  { %3458 = vst [vmem:[#allocation12_spill] sm:$0xff] %v2838_v40 }
  0x5b   :  { %1284 = vmatpush1.bf16.msra.mxu0 %v2266_v41  ;;  %1407 = vmatpush1.bf16.msra.mxu1 %v2267_v44  ;;  %v2840_v41 = vld [vmem:[#allocation8 + $0x2ec] ss:$16 sps:$4 sm:$0xff]   ;;  %v2846_v44 = vld [vmem:[#allocation8 + $0x2e8] ss:$16 sps:$4 sm:$0xff]  }
  0x5c   :  { %1285 = vmatprep.subr.bf16.mxu0 %v2268_v45  ;;  %1408 = vmatprep.subr.bf16.mxu1 %v2270_v46  ;;  %3459 = vst [vmem:[#allocation13_spill] sm:$0xff] %v2840_v41  ;;  %3461 = vst [vmem:[#allocation15_spill] sm:$0xff] %v2846_v44  ;;  %v2850_v45 = vld [vmem:[#allocation8 + $0x304] ss:$16 sps:$4 sm:$0xff]   ;;  %v2852_v46 = vld [vmem:[#allocation8 + $0x30c] ss:$16 sps:$4 sm:$0xff]  }
  0x5d   :  { %3462 = vst [vmem:[#allocation16_spill] sm:$0xff] %v2850_v45  ;;  %3463 = vst [vmem:[#allocation17_spill] sm:$0xff] %v2852_v46 }
  0x5f   :  { %1286 = vmatpush1.bf16.msra.mxu0 %v2677_v47  ;;  %1409 = vmatpush1.bf16.msra.mxu1 %v2679_v48 }
  0x60   :  { %1287 = vmatprep.subr.bf16.mxu0 %v2684_v50  ;;  %1410 = vmatprep.subr.bf16.mxu1 %v2686_v51 }
  0x63   :  { %1288 = vmatpush1.bf16.msra.mxu0 %v2690_v53  ;;  %1411 = vmatpush1.bf16.msra.mxu1 %v2696_v55 }
  0x64   :  { %1289 = vmatprep.subr.bf16.mxu0 %v2700_v56  ;;  %1412 = vmatprep.subr.bf16.mxu1 %v2702_v57 }
  0x67   :  { %1290 = vmatpush1.bf16.msra.mxu0 %v2704_v59  ;;  %1413 = vmatpush1.bf16.msra.mxu1 %v2709_v61 }
  0x68   :  { %1291 = vmatprep.subr.bf16.mxu0 %v2713_v62  ;;  %1414 = vmatprep.subr.bf16.mxu1 %v2715_v63 }
  0x6b   :  { %1292 = vmatpush1.bf16.msra.mxu0 %v2717_v0  ;;  %1415 = vmatpush1.bf16.msra.mxu1 %v2721_v1 }
  0x6c   :  { %1293 = vmatprep.subr.bf16.mxu0 %v2725_v2  ;;  %1416 = vmatprep.subr.bf16.mxu1 %v2727_v3 }
  0x6f   :  { %1294 = vmatpush1.bf16.msra.mxu0 %v2729_v4  ;;  %1417 = vmatpush1.bf16.msra.mxu1 %v2733_v5 }
  0x70   :  { %1295 = vmatprep.subr.bf16.mxu0 %v2737_v6  ;;  %1418 = vmatprep.subr.bf16.mxu1 %v2739_v7 }
  0x73   :  { %1296 = vmatpush1.bf16.msra.mxu0 %v2741_v8  ;;  %1419 = vmatpush1.bf16.msra.mxu1 %v2745_v9 }
  0x74   :  { %1306 = vmatprep.subr.bf16.mxu0 %v2749_v10  ;;  %1429 = vmatprep.subr.bf16.mxu1 %v2751_v11 }
  0x76   :  { %1298 = vmatmul.mubr.bf16.vlgmr.msra.gmra.mrb[0].mxu0 %v2756_v13  ;;  %1421 = vmatmul.mubr.bf16.vlgmr.msra.gmra.mrb[0].mxu1 %v2756_v13 }
  0x77   :  { %1307 = vmatpush1.bf16.msra.mxu0 %v2753_v12  ;;  %1430 = vmatpush1.bf16.msra.mxu1 %v2760_v14 }
  0x78   :  { %1308 = vmatprep.subr.bf16.mxu0 %v2764_v15  ;;  %1431 = vmatprep.subr.bf16.mxu1 %v2766_v16 }
  0x79   :  { %1338 = vmatprep.mubr.bf16.mxu0 %v298_v17  ;;  %1461 = vmatprep.mubr.bf16.mxu1 %v298_v17  ;;  %v2864_v17 = vld [vmem:[#allocation8 + $0x32c] ss:$16 sps:$4 sm:$0xff]  }
  0x7a   :  { %3467 = vst [vmem:[#allocation21_spill] sm:$0xff] %v2864_v17 }
  0x7b   :  { %1309 = vmatpush1.bf16.msra.mxu0 %v2770_v18  ;;  %1432 = vmatpush1.bf16.msra.mxu1 %v2774_v19 }
  0x7c   :  { %1310 = vmatprep.subr.bf16.mxu0 %v2778_v20  ;;  %1433 = vmatprep.subr.bf16.mxu1 %v2780_v21 }
  0x7f   :  { %1311 = vmatpush1.bf16.msra.mxu0 %v2782_v22  ;;  %1434 = vmatpush1.bf16.msra.mxu1 %v2786_v23 }
  0x80   :  { %1312 = vmatprep.subr.bf16.mxu0 %v2790_v24  ;;  %1435 = vmatprep.subr.bf16.mxu1 %v2792_v25 }
  0x83   :  { %1313 = vmatpush1.bf16.msra.mxu0 %v2794_v26  ;;  %1436 = vmatpush1.bf16.msra.mxu1 %v2798_v27 }
  0x84   :  { %1314 = vmatprep.subr.bf16.mxu0 %v2802_v28  ;;  %1437 = vmatprep.subr.bf16.mxu1 %v2804_v29 }
  0x87   :  { %1315 = vmatpush1.bf16.msra.mxu0 %v2806_v30  ;;  %1438 = vmatpush1.bf16.msra.mxu1 %v2810_v31 }
  0x88   :  { %1316 = vmatprep.subr.bf16.mxu0 %v2814_v32  ;;  %1439 = vmatprep.subr.bf16.mxu1 %v2816_v33 }
  0x8b   :  { %1317 = vmatpush1.bf16.msra.mxu0 %v2818_v34  ;;  %1440 = vmatpush1.bf16.msra.mxu1 %v2822_v35 }
  0x8c   :  { %1318 = vmatprep.subr.bf16.mxu0 %v2826_v36  ;;  %1441 = vmatprep.subr.bf16.mxu1 %v2828_v37 }
  0x8f   :  { %1319 = vmatpush1.bf16.msra.mxu0 %v2830_v38  ;;  %1442 = vmatpush1.bf16.msra.mxu1 %v2834_v39 }
  0x90   :  { %1320 = vmatprep.subr.bf16.mxu0 %v2838_v40  ;;  %1443 = vmatprep.subr.bf16.mxu1 %v2840_v41  ;;  %v2870_v41 = vld [vmem:[#allocation8 + $0x328] ss:$16 sps:$4 sm:$0xff]  }
  0x91   :  { %3469 = vst [vmem:[#allocation23_spill] sm:$0xff] %v2870_v41 }
  0x93   :  { %1321 = vmatpush1.bf16.msra.mxu0 %v2842_v42  ;;  %1444 = vmatpush1.bf16.msra.mxu1 %v2846_v44  ;;  %v2874_v44 = vld [vmem:[#allocation8 + $0x344] ss:$16 sps:$4 sm:$0xff]   ;;  %v2882_v42 = vld [vmem:[#allocation8 + $0x348] ss:$16 sps:$4 sm:$0xff]  }
  0x94   :  { %1322 = vmatprep.subr.bf16.mxu0 %v2850_v45  ;;  %1445 = vmatprep.subr.bf16.mxu1 %v2852_v46  ;;  %3470 = vst [vmem:[#allocation24_spill] sm:$0xff] %v2874_v44  ;;  %v2876_v45 = vld [vmem:[#allocation8 + $0x34c] ss:$16 sps:$4 sm:$0xff]   ;;  %v2878_v46 = vld [vmem:[#allocation8 + $0x340] ss:$16 sps:$4 sm:$0xff]   ;;  %3473 = vst [vmem:[#allocation27_spill] sm:$0xff] %v2882_v42 }
  0x95   :  { %3471 = vst [vmem:[#allocation25_spill] sm:$0xff] %v2876_v45  ;;  %3472 = vst [vmem:[#allocation26_spill] sm:$0xff] %v2878_v46 }
  0x97   :  { %1323 = vmatpush1.bf16.msra.mxu0 %v2854_v54  ;;  %1446 = vmatpush1.bf16.msra.mxu1 %v2858_v58  ;;  %v2886_v58 = vld [vmem:[#allocation8 + $0x364] ss:$16 sps:$4 sm:$0xff]   ;;  %v2894_v54 = vld [vmem:[#allocation8 + $0x368] ss:$16 sps:$4 sm:$0xff]  }
  0x98   :  { %1324 = vmatprep.subr.bf16.mxu0 %v2862_v60  ;;  %1447 = vmatprep.subr.bf16.mxu1 %v2864_v17  ;;  %3474 = vst [vmem:[#allocation28_spill] sm:$0xff] %v2886_v58  ;;  %v2888_v60 = vld [vmem:[#allocation8 + $0x36c] ss:$16 sps:$4 sm:$0xff]   ;;  %v2890_v17 = vld [vmem:[#allocation8 + $0x360] ss:$16 sps:$4 sm:$0xff]   ;;  %3477 = vst [vmem:[#allocation31_spill] sm:$0xff] %v2894_v54 }
  0x99   :  { %3475 = vst [vmem:[#allocation29_spill] sm:$0xff] %v2888_v60  ;;  %3476 = vst [vmem:[#allocation30_spill] sm:$0xff] %v2890_v17 }
  0x9b   :  { %1325 = vmatpush1.bf16.msra.mxu0 %v2866_v43  ;;  %1448 = vmatpush1.bf16.msra.mxu1 %v2870_v41  ;;  %v2898_v41 = vld [vmem:[#allocation8 + $0x384] ss:$16 sps:$4 sm:$0xff]   ;;  %v2906_v43 = vld [vmem:[#allocation8 + $0x388] ss:$16 sps:$4 sm:$0xff]  }
  0x9c   :  { %1326 = vmatprep.subr.bf16.mxu0 %v2874_v44  ;;  %1449 = vmatprep.subr.bf16.mxu1 %v2876_v45  ;;  %3478 = vst [vmem:[#allocation32_spill] sm:$0xff] %v2898_v41  ;;  %v2900_v44 = vld [vmem:[#allocation8 + $0x38c] ss:$16 sps:$4 sm:$0xff]   ;;  %v2902_v45 = vld [vmem:[#allocation8 + $0x380] ss:$16 sps:$4 sm:$0xff]   ;;  %3481 = vst [vmem:[#allocation35_spill] sm:$0xff] %v2906_v43 }
  0x9d   :  { %3479 = vst [vmem:[#allocation33_spill] sm:$0xff] %v2900_v44  ;;  %3480 = vst [vmem:[#allocation34_spill] sm:$0xff] %v2902_v45 }
  0x9f   :  { %1327 = vmatpush1.bf16.msra.mxu0 %v2878_v46  ;;  %1450 = vmatpush1.bf16.msra.mxu1 %v2882_v42  ;;  %v2910_v42 = vld [vmem:[#allocation8 + $0x3a4] ss:$16 sps:$4 sm:$0xff]   ;;  %v2918_v46 = vld [vmem:[#allocation8 + $0x3a8] ss:$16 sps:$4 sm:$0xff]  }
  0xa0   :  { %1328 = vmatprep.subr.bf16.mxu0 %v2886_v58  ;;  %1451 = vmatprep.subr.bf16.mxu1 %v2888_v60  ;;  %3482 = vst [vmem:[#allocation36_spill] sm:$0xff] %v2910_v42  ;;  %v2912_v58 = vld [vmem:[#allocation8 + $0x3ac] ss:$16 sps:$4 sm:$0xff]   ;;  %v2914_v60 = vld [vmem:[#allocation8 + $0x3a0] ss:$16 sps:$4 sm:$0xff]   ;;  %3485 = vst [vmem:[#allocation39_spill] sm:$0xff] %v2918_v46 }
  0xa1   :  { %3483 = vst [vmem:[#allocation37_spill] sm:$0xff] %v2912_v58  ;;  %3484 = vst [vmem:[#allocation38_spill] sm:$0xff] %v2914_v60 }
  0xa3   :  { %1329 = vmatpush1.bf16.msra.mxu0 %v2890_v17  ;;  %1452 = vmatpush1.bf16.msra.mxu1 %v2894_v54  ;;  %v2922_v54 = vld [vmem:[#allocation8 + $0x3c4] ss:$16 sps:$4 sm:$0xff]   ;;  %v2928_v17 = vld [vmem:[#allocation8 + $0x3c0] ss:$16 sps:$4 sm:$0xff]  }
  0xa4   :  { %1330 = vmatprep.subr.bf16.mxu0 %v2898_v41  ;;  %1453 = vmatprep.subr.bf16.mxu1 %v2900_v44  ;;  %3486 = vst [vmem:[#allocation40_spill] sm:$0xff] %v2922_v54  ;;  %v2924_v41 = vld [vmem:[#allocation8 + $0x3cc] ss:$16 sps:$4 sm:$0xff]   ;;  %v252_v44 = vcombine.high %v2688_v52, %v2688_v52  ;;  %3488 = vst [vmem:[#allocation42_spill] sm:$0xff] %v2928_v17  ;;  %v2943_v52 = vld [vmem:[#allocation8 + $0x3e0] ss:$16 sps:$4 sm:$0xff]  }
  0xa5   :  { %3487 = vst [vmem:[#allocation41_spill] sm:$0xff] %v2924_v41  ;;  %3492 = vst [vmem:[#allocation46_spill] sm:$0xff] %v2943_v52 }
  0xa7   :  { %1331 = vmatpush1.bf16.msra.mxu0 %v2902_v45  ;;  %1454 = vmatpush1.bf16.msra.mxu1 %v2906_v43  ;;  %v2932_v43 = vld [vmem:[#allocation8 + $0x3c8] ss:$16 sps:$4 sm:$0xff]   ;;  %v2941_v45 = vrot.slane %v252_v44, %v2682_v49 }
  0xa8   :  { %1332 = vmatprep.subr.bf16.mxu0 %v2910_v42  ;;  %1455 = vmatprep.subr.bf16.mxu1 %v2912_v58  ;;  %3489 = vst [vmem:[#allocation43_spill] sm:$0xff] %v2932_v43  ;;  %v2936_v58 = vld [vmem:[#allocation8 + $0x3e4] ss:$16 sps:$4 sm:$0xff]   ;;  %v2938_v42 = vld [vmem:[#allocation8 + $0x3ec] ss:$16 sps:$4 sm:$0xff]  }
  0xa9   :  { %3490 = vst [vmem:[#allocation44_spill] sm:$0xff] %v2936_v58  ;;  %3491 = vst [vmem:[#allocation45_spill] sm:$0xff] %v2938_v42  ;;  %v268_v44 = vcombine.high %v2941_v45, %v2941_v45 }
  0xab   :  { %1333 = vmatpush1.bf16.msra.mxu0 %v2914_v60  ;;  %1456 = vmatpush1.bf16.msra.mxu1 %v2918_v46  ;;  %v2947_v46 = vld [vmem:[#allocation8 + $0x3e8] ss:$16 sps:$4 sm:$0xff]   ;;  %v297_v60 = vcombine.high %v2756_v13, %v2756_v13  ;;  %v296_v40 = vrot.slane %v268_v44, %v2682_v49  ;;  %v2974_v13 = vld [vmem:[#allocation8 + $0x420] ss:$16 sps:$4 sm:$0xff]  }
  0xac   :  { %1334 = vmatprep.subr.bf16.mxu0 %v2922_v54  ;;  %1457 = vmatprep.subr.bf16.mxu1 %v2924_v41  ;;  %3493 = vst [vmem:[#allocation47_spill] sm:$0xff] %v2947_v46  ;;  %v2951_v41 = vld [vmem:[#allocation8 + $0x404] ss:$16 sps:$4 sm:$0xff]   ;;  %v2953_v54 = vld [vmem:[#allocation8 + $0x40c] ss:$16 sps:$4 sm:$0xff]   ;;  %3500 = vst [vmem:[#allocation54_spill] sm:$0xff] %v2974_v13 }
  0xad   :  { %3494 = vst [vmem:[#allocation48_spill] sm:$0xff] %v2951_v41  ;;  %3495 = vst [vmem:[#allocation49_spill] sm:$0xff] %v2953_v54  ;;  %v2988_v44 = vld [vmem:[#allocation8 + $0x448] ss:$16 sps:$4 sm:$0xff]  }
  0xae   :  { %3505 = vst [vmem:[#allocation59_spill] sm:$0xff] %v2988_v44 }
  0xaf   :  { %1335 = vmatpush1.bf16.msra.mxu0 %v2928_v17  ;;  %1458 = vmatpush1.bf16.msra.mxu1 %v2932_v43  ;;  %v2961_v43 = vld [vmem:[#allocation8 + $0x400] ss:$16 sps:$4 sm:$0xff]   ;;  %v2963_v17 = vld [vmem:[#allocation8 + $0x408] ss:$16 sps:$4 sm:$0xff]  }
  0xb0   :  { %1336 = vmatprep.subr.bf16.mxu0 %v2936_v58  ;;  %1459 = vmatprep.subr.bf16.mxu1 %v2938_v42  ;;  %3496 = vst [vmem:[#allocation50_spill] sm:$0xff] %v2961_v43  ;;  %3497 = vst [vmem:[#allocation51_spill] sm:$0xff] %v2963_v17  ;;  %v2967_v42 = vld [vmem:[#allocation8 + $0x424] ss:$16 sps:$4 sm:$0xff]   ;;  %v2969_v58 = vld [vmem:[#allocation8 + $0x42c] ss:$16 sps:$4 sm:$0xff]  }
  0xb1   :  { %3498 = vst [vmem:[#allocation52_spill] sm:$0xff] %v2967_v42  ;;  %3499 = vst [vmem:[#allocation53_spill] sm:$0xff] %v2969_v58 }
  0xb3   :  { %1337 = vmatpush1.bf16.msra.mxu0 %v2943_v52  ;;  %1460 = vmatpush1.bf16.msra.mxu1 %v2947_v46  ;;  %v2976_v46 = vld [vmem:[#allocation8 + $0x428] ss:$16 sps:$4 sm:$0xff]   ;;  %v2504_v52 = vld [vmem:[#allocation8 + $0x24] ss:$16 sps:$4 sm:$0xff]  }
  0xb4   :  { %1347 = vmatprep.subr.bf16.mxu0 %v2951_v41  ;;  %1470 = vmatprep.subr.bf16.mxu1 %v2953_v54  ;;  %3501 = vst [vmem:[#allocation55_spill] sm:$0xff] %v2976_v46  ;;  %v2980_v54 = vld [vmem:[#allocation8 + $0x444] ss:$16 sps:$4 sm:$0xff]   ;;  %v2982_v41 = vld [vmem:[#allocation8 + $0x44c] ss:$16 sps:$4 sm:$0xff]  }
  0xb5   :  { %3502 = vst [vmem:[#allocation56_spill] sm:$0xff] %v2980_v54  ;;  %3503 = vst [vmem:[#allocation57_spill] sm:$0xff] %v2982_v41 }
  0xb6   :  { %1339 = vmatmul.mubr.bf16.vlgmr.msra.gmra.mrb[0].mxu0 %v297_v60  ;;  %1462 = vmatmul.mubr.bf16.vlgmr.msra.gmra.mrb[0].mxu1 %v297_v60  ;;  %v2986_v60 = vld [vmem:[#allocation8 + $0x440] ss:$16 sps:$4 sm:$0xff]  }
  0xb7   :  { %1348 = vmatpush1.bf16.msra.mxu0 %v2961_v43  ;;  %1471 = vmatpush1.bf16.msra.mxu1 %v2963_v17  ;;  %3504 = vst [vmem:[#allocation58_spill] sm:$0xff] %v2986_v60 }
  0xb8   :  { %1349 = vmatprep.subr.bf16.mxu0 %v2967_v42  ;;  %1472 = vmatprep.subr.bf16.mxu1 %v2969_v58  ;;  %v2992_v42 = vld [vmem:[#allocation8 + $0x464] ss:$16 sps:$4 sm:$0xff]   ;;  %v2994_v58 = vld [vmem:[#allocation8 + $0x46c] ss:$16 sps:$4 sm:$0xff]  }
  0xb9   :  { %1379 = vmatprep.mubr.bf16.mxu0 %v296_v40  ;;  %1502 = vmatprep.mubr.bf16.mxu1 %v296_v40  ;;  %3506 = vst [vmem:[#allocation60_spill] sm:$0xff] %v2992_v42  ;;  %3507 = vst [vmem:[#allocation61_spill] sm:$0xff] %v2994_v58  ;;  %v2998_v40 = vld [vmem:[#allocation8 + $0x460] ss:$16 sps:$4 sm:$0xff]  }
  0xba   :  { %3508 = vst [vmem:[#allocation62_spill] sm:$0xff] %v2998_v40 }
  0xbb   :  { %1350 = vmatpush1.bf16.msra.mxu0 %v2974_v13  ;;  %1473 = vmatpush1.bf16.msra.mxu1 %v2976_v46  ;;  %v3000_v13 = vld [vmem:[#allocation8 + $0x468] ss:$16 sps:$4 sm:$0xff]   ;;  %v3004_v46 = vld [vmem:[#allocation8 + $0x484] ss:$16 sps:$4 sm:$0xff]  }
  0xbc   :  { %1351 = vmatprep.subr.bf16.mxu0 %v2980_v54  ;;  %1474 = vmatprep.subr.bf16.mxu1 %v2982_v41  ;;  %3509 = vst [vmem:[#allocation63_spill] sm:$0xff] %v3000_v13  ;;  %3510 = vst [vmem:[#allocation64_spill] sm:$0xff] %v3004_v46  ;;  %v3006_v54 = vld [vmem:[#allocation8 + $0x48c] ss:$16 sps:$4 sm:$0xff]   ;;  %v3010_v41 = vld [vmem:[#allocation8 + $0x480] ss:$16 sps:$4 sm:$0xff]  }
  0xbd   :  { %3511 = vst [vmem:[#allocation65_spill] sm:$0xff] %v3006_v54  ;;  %3512 = vst [vmem:[#allocation66_spill] sm:$0xff] %v3010_v41 }
  0xbf   :  { %1352 = vmatpush1.bf16.msra.mxu0 %v2986_v60  ;;  %1475 = vmatpush1.bf16.msra.mxu1 %v2988_v44  ;;  %v3012_v60 = vld [vmem:[#allocation8 + $0x488] ss:$16 sps:$4 sm:$0xff]   ;;  %v3016_v44 = vld [vmem:[#allocation8 + $0x4a4] ss:$16 sps:$4 sm:$0xff]  }
  0xc0   :  { %1353 = vmatprep.subr.bf16.mxu0 %v2992_v42  ;;  %1476 = vmatprep.subr.bf16.mxu1 %v2994_v58  ;;  %3513 = vst [vmem:[#allocation67_spill] sm:$0xff] %v3012_v60  ;;  %3514 = vst [vmem:[#allocation68_spill] sm:$0xff] %v3016_v44  ;;  %v3018_v42 = vld [vmem:[#allocation8 + $0x4ac] ss:$16 sps:$4 sm:$0xff]   ;;  %v3022_v58 = vld [vmem:[#allocation8 + $0x4a0] ss:$16 sps:$4 sm:$0xff]  }
  0xc1   :  { %3515 = vst [vmem:[#allocation69_spill] sm:$0xff] %v3018_v42  ;;  %3516 = vst [vmem:[#allocation70_spill] sm:$0xff] %v3022_v58 }
  0xc3   :  { %1354 = vmatpush1.bf16.msra.mxu0 %v2998_v40  ;;  %1477 = vmatpush1.bf16.msra.mxu1 %v3000_v13  ;;  %v3024_v40 = vld [vmem:[#allocation8 + $0x4a8] ss:$16 sps:$4 sm:$0xff]   ;;  %v3028_v13 = vld [vmem:[#allocation8 + $0x4c4] ss:$16 sps:$4 sm:$0xff]  }
  0xc4   :  { %1355 = vmatprep.subr.bf16.mxu0 %v3004_v46  ;;  %1478 = vmatprep.subr.bf16.mxu1 %v3006_v54  ;;  %3517 = vst [vmem:[#allocation71_spill] sm:$0xff] %v3024_v40  ;;  %3518 = vst [vmem:[#allocation72_spill] sm:$0xff] %v3028_v13  ;;  %v3030_v46 = vld [vmem:[#allocation8 + $0x4cc] ss:$16 sps:$4 sm:$0xff]   ;;  %v3034_v54 = vld [vmem:[#allocation8 + $0x4c0] ss:$16 sps:$4 sm:$0xff]  }
  0xc5   :  { %3519 = vst [vmem:[#allocation73_spill] sm:$0xff] %v3030_v46  ;;  %3520 = vst [vmem:[#allocation74_spill] sm:$0xff] %v3034_v54 }
  0xc7   :  { %1356 = vmatpush1.bf16.msra.mxu0 %v3010_v41  ;;  %1479 = vmatpush1.bf16.msra.mxu1 %v3012_v60  ;;  %v3036_v41 = vld [vmem:[#allocation8 + $0x4c8] ss:$16 sps:$4 sm:$0xff]   ;;  %v3040_v60 = vld [vmem:[#allocation8 + $0x4e4] ss:$16 sps:$4 sm:$0xff]  }
  0xc8   :  { %1357 = vmatprep.subr.bf16.mxu0 %v3016_v44  ;;  %1480 = vmatprep.subr.bf16.mxu1 %v3018_v42  ;;  %3521 = vst [vmem:[#allocation75_spill] sm:$0xff] %v3036_v41  ;;  %3522 = vst [vmem:[#allocation76_spill] sm:$0xff] %v3040_v60  ;;  %v3042_v44 = vld [vmem:[#allocation8 + $0x4ec] ss:$16 sps:$4 sm:$0xff]   ;;  %v3046_v42 = vld [vmem:[#allocation8 + $0x4e0] ss:$16 sps:$4 sm:$0xff]  }
  0xc9   :  { %3523 = vst [vmem:[#allocation77_spill] sm:$0xff] %v3042_v44  ;;  %3524 = vst [vmem:[#allocation78_spill] sm:$0xff] %v3046_v42 }
  0xcb   :  { %1358 = vmatpush1.bf16.msra.mxu0 %v3022_v58  ;;  %1481 = vmatpush1.bf16.msra.mxu1 %v3024_v40  ;;  %v3048_v58 = vld [vmem:[#allocation8 + $0x4e8] ss:$16 sps:$4 sm:$0xff]   ;;  %v3052_v40 = vld [vmem:[#allocation8 + $0x504] ss:$16 sps:$4 sm:$0xff]  }
  0xcc   :  { %1359 = vmatprep.subr.bf16.mxu0 %v3028_v13  ;;  %1482 = vmatprep.subr.bf16.mxu1 %v3030_v46  ;;  %3525 = vst [vmem:[#allocation79_spill] sm:$0xff] %v3048_v58  ;;  %3526 = vst [vmem:[#allocation80_spill] sm:$0xff] %v3052_v40  ;;  %v3054_v13 = vld [vmem:[#allocation8 + $0x50c] ss:$16 sps:$4 sm:$0xff]   ;;  %v3058_v46 = vld [vmem:[#allocation8 + $0x500] ss:$16 sps:$4 sm:$0xff]  }
  0xcd   :  { %3527 = vst [vmem:[#allocation81_spill] sm:$0xff] %v3054_v13  ;;  %3528 = vst [vmem:[#allocation82_spill] sm:$0xff] %v3058_v46 }
  0xcf   :  { %1360 = vmatpush1.bf16.msra.mxu0 %v3034_v54  ;;  %1483 = vmatpush1.bf16.msra.mxu1 %v3036_v41  ;;  %v3060_v54 = vld [vmem:[#allocation8 + $0x508] ss:$16 sps:$4 sm:$0xff]   ;;  %v3064_v41 = vld [vmem:[#allocation8 + $0x524] ss:$16 sps:$4 sm:$0xff]  }
  0xd0   :  { %1361 = vmatprep.subr.bf16.mxu0 %v3040_v60  ;;  %1484 = vmatprep.subr.bf16.mxu1 %v3042_v44  ;;  %3529 = vst [vmem:[#allocation83_spill] sm:$0xff] %v3060_v54  ;;  %3530 = vst [vmem:[#allocation84_spill] sm:$0xff] %v3064_v41  ;;  %v3066_v60 = vld [vmem:[#allocation8 + $0x52c] ss:$16 sps:$4 sm:$0xff]   ;;  %v3070_v44 = vld [vmem:[#allocation8 + $0x520] ss:$16 sps:$4 sm:$0xff]  }
  0xd1   :  { %3531 = vst [vmem:[#allocation85_spill] sm:$0xff] %v3066_v60  ;;  %3532 = vst [vmem:[#allocation86_spill] sm:$0xff] %v3070_v44 }
  0xd3   :  { %1362 = vmatpush1.bf16.msra.mxu0 %v3046_v42  ;;  %1485 = vmatpush1.bf16.msra.mxu1 %v3048_v58  ;;  %v3072_v42 = vld [vmem:[#allocation8 + $0x528] ss:$16 sps:$4 sm:$0xff]   ;;  %v3076_v58 = vld [vmem:[#allocation8 + $0x544] ss:$16 sps:$4 sm:$0xff]  }
  0xd4   :  { %1363 = vmatprep.subr.bf16.mxu0 %v3052_v40  ;;  %1486 = vmatprep.subr.bf16.mxu1 %v3054_v13  ;;  %3533 = vst [vmem:[#allocation87_spill] sm:$0xff] %v3072_v42  ;;  %3534 = vst [vmem:[#allocation88_spill] sm:$0xff] %v3076_v58  ;;  %v3078_v40 = vld [vmem:[#allocation8 + $0x54c] ss:$16 sps:$4 sm:$0xff]   ;;  %v3082_v13 = vld [vmem:[#allocation8 + $0x540] ss:$16 sps:$4 sm:$0xff]  }
  0xd5   :  { %3535 = vst [vmem:[#allocation89_spill] sm:$0xff] %v3078_v40  ;;  %3536 = vst [vmem:[#allocation90_spill] sm:$0xff] %v3082_v13 }
  0xd7   :  { %1364 = vmatpush1.bf16.msra.mxu0 %v3058_v46  ;;  %1487 = vmatpush1.bf16.msra.mxu1 %v3060_v54  ;;  %v3084_v46 = vld [vmem:[#allocation8 + $0x548] ss:$16 sps:$4 sm:$0xff]   ;;  %v3088_v54 = vld [vmem:[#allocation8 + $0x564] ss:$16 sps:$4 sm:$0xff]  }
  0xd8   :  { %1365 = vmatprep.subr.bf16.mxu0 %v3064_v41  ;;  %1488 = vmatprep.subr.bf16.mxu1 %v3066_v60  ;;  %3537 = vst [vmem:[#allocation91_spill] sm:$0xff] %v3084_v46  ;;  %3538 = vst [vmem:[#allocation92_spill] sm:$0xff] %v3088_v54  ;;  %v3090_v41 = vld [vmem:[#allocation8 + $0x56c] ss:$16 sps:$4 sm:$0xff]   ;;  %v3094_v60 = vld [vmem:[#allocation8 + $0x560] ss:$16 sps:$4 sm:$0xff]  }
  0xd9   :  { %3539 = vst [vmem:[#allocation93_spill] sm:$0xff] %v3090_v41  ;;  %3540 = vst [vmem:[#allocation94_spill] sm:$0xff] %v3094_v60 }
  0xdb   :  { %1366 = vmatpush1.bf16.msra.mxu0 %v3070_v44  ;;  %1489 = vmatpush1.bf16.msra.mxu1 %v3072_v42  ;;  %v3096_v44 = vld [vmem:[#allocation8 + $0x568] ss:$16 sps:$4 sm:$0xff]   ;;  %v3100_v42 = vld [vmem:[#allocation8 + $0x584] ss:$16 sps:$4 sm:$0xff]  }
  0xdc   :  { %1367 = vmatprep.subr.bf16.mxu0 %v3076_v58  ;;  %1490 = vmatprep.subr.bf16.mxu1 %v3078_v40  ;;  %3541 = vst [vmem:[#allocation95_spill] sm:$0xff] %v3096_v44  ;;  %3542 = vst [vmem:[#allocation96_spill] sm:$0xff] %v3100_v42  ;;  %v3102_v58 = vld [vmem:[#allocation8 + $0x58c] ss:$16 sps:$4 sm:$0xff]   ;;  %v3106_v40 = vld [vmem:[#allocation8 + $0x580] ss:$16 sps:$4 sm:$0xff]  }
  0xdd   :  { %3543 = vst [vmem:[#allocation97_spill] sm:$0xff] %v3102_v58  ;;  %3544 = vst [vmem:[#allocation98_spill] sm:$0xff] %v3106_v40 }
  0xdf   :  { %1368 = vmatpush1.bf16.msra.mxu0 %v3082_v13  ;;  %1491 = vmatpush1.bf16.msra.mxu1 %v3084_v46  ;;  %v3108_v13 = vld [vmem:[#allocation8 + $0x588] ss:$16 sps:$4 sm:$0xff]   ;;  %v3112_v46 = vld [vmem:[#allocation8 + $0x5a4] ss:$16 sps:$4 sm:$0xff]  }
  0xe0   :  { %1369 = vmatprep.subr.bf16.mxu0 %v3088_v54  ;;  %1492 = vmatprep.subr.bf16.mxu1 %v3090_v41  ;;  %3545 = vst [vmem:[#allocation99_spill] sm:$0xff] %v3108_v13  ;;  %3546 = vst [vmem:[#allocation100_spill] sm:$0xff] %v3112_v46  ;;  %v3114_v54 = vld [vmem:[#allocation8 + $0x5ac] ss:$16 sps:$4 sm:$0xff]   ;;  %v3118_v41 = vld [vmem:[#allocation8 + $0x5a0] ss:$16 sps:$4 sm:$0xff]  }
  0xe1   :  { %3547 = vst [vmem:[#allocation101_spill] sm:$0xff] %v3114_v54  ;;  %3548 = vst [vmem:[#allocation102_spill] sm:$0xff] %v3118_v41 }
  0xe3   :  { %1370 = vmatpush1.bf16.msra.mxu0 %v3094_v60  ;;  %1493 = vmatpush1.bf16.msra.mxu1 %v3096_v44  ;;  %v3120_v60 = vld [vmem:[#allocation8 + $0x5a8] ss:$16 sps:$4 sm:$0xff]   ;;  %v3124_v44 = vld [vmem:[#allocation8 + $0x5c4] ss:$16 sps:$4 sm:$0xff]  }
  0xe4   :  { %1371 = vmatprep.subr.bf16.mxu0 %v3100_v42  ;;  %1494 = vmatprep.subr.bf16.mxu1 %v3102_v58  ;;  %3549 = vst [vmem:[#allocation103_spill] sm:$0xff] %v3120_v60  ;;  %3550 = vst [vmem:[#allocation104_spill] sm:$0xff] %v3124_v44  ;;  %v3126_v42 = vld [vmem:[#allocation8 + $0x5cc] ss:$16 sps:$4 sm:$0xff]  }
  0xe5   :  { %3551 = vst [vmem:[#allocation105_spill] sm:$0xff] %v3126_v42  ;;  %v3128_v58 = vld [vmem:[#allocation6] sm:$0x3f] }
  0xe6   :  { %3552 = vst [vmem:[#allocation106_spill] sm:$0xff] %v3128_v58  ;;  %v3144_v17 = vrot.slane %v3128_v58, %v2682_v49  ;;  %v2516_v58 = vld [vmem:[#allocation8 + $0x84] ss:$16 sps:$4 sm:$0xff]  }
  0xe7   :  { %1372 = vmatpush1.bf16.msra.mxu0 %v3106_v40  ;;  %1495 = vmatpush1.bf16.msra.mxu1 %v3108_v13  ;;  %v3132_v40 = vld [vmem:[#allocation8 + $0x5c0] ss:$16 sps:$4 sm:$0xff]   ;;  %v3134_v13 = vld [vmem:[#allocation8 + $0x5c8] ss:$16 sps:$4 sm:$0xff]  }
  0xe8   :  { %1373 = vmatprep.subr.bf16.mxu0 %v3112_v46  ;;  %1496 = vmatprep.subr.bf16.mxu1 %v3114_v54  ;;  %3553 = vst [vmem:[#allocation107_spill] sm:$0xff] %v3132_v40  ;;  %3554 = vst [vmem:[#allocation108_spill] sm:$0xff] %v3134_v13  ;;  %v3138_v46 = vld [vmem:[#allocation8 + $0x5e4] ss:$16 sps:$4 sm:$0xff]   ;;  %v3140_v54 = vld [vmem:[#allocation8 + $0x5ec] ss:$16 sps:$4 sm:$0xff]  }
  0xe9   :  { %3555 = vst [vmem:[#allocation109_spill] sm:$0xff] %v3138_v46  ;;  %3556 = vst [vmem:[#allocation110_spill] sm:$0xff] %v3140_v54 }
  0xeb   :  { %1374 = vmatpush1.bf16.msra.mxu0 %v3118_v41  ;;  %1497 = vmatpush1.bf16.msra.mxu1 %v3120_v60  ;;  %v3148_v60 = vld [vmem:[#allocation8 + $0x5e0] ss:$16 sps:$4 sm:$0xff]   ;;  %v3150_v41 = vld [vmem:[#allocation8 + $0x5e8] ss:$16 sps:$4 sm:$0xff]  }
  0xec   :  { %1375 = vmatprep.subr.bf16.mxu0 %v3124_v44  ;;  %1498 = vmatprep.subr.bf16.mxu1 %v3126_v42  ;;  %3557 = vst [vmem:[#allocation111_spill] sm:$0xff] %v3148_v60  ;;  %3558 = vst [vmem:[#allocation112_spill] sm:$0xff] %v3150_v41  ;;  %v1553_v42 = vcombine.high %v3144_v17, %v3144_v17  ;;  %v282_v44 = vrot.slane %v2941_v45, %v2682_v49  ;;  %v2505_v45 = vld [vmem:[#allocation8 + $0x2c] ss:$16 sps:$4 sm:$0xff]  }
  0xee   :  { %v3161_v43 = vrot.slane %v1553_v42, %v2682_v49  ;;  %v2508_v42 = vld [vmem:[#allocation8 + $0x44] ss:$16 sps:$4 sm:$0xff]  }
  0xef   :  { %1376 = vmatpush1.bf16.msra.mxu0 %v3132_v40  ;;  %1499 = vmatpush1.bf16.msra.mxu1 %v3134_v13  ;;  %v2500_v40 = vld [vmem:[#allocation8 + $0x4] ss:$16 sps:$4 sm:$0xff]   ;;  %v2501_v13 = vld [vmem:[#allocation8 + $0xc] ss:$16 sps:$4 sm:$0xff]  }
  0xf0   :  { %1377 = vmatprep.subr.bf16.mxu0 %v3138_v46  ;;  %1500 = vmatprep.subr.bf16.mxu1 %v3140_v54  ;;  %v2502_v54 = vld [vmem:[#allocation8] ss:$16 sps:$4 sm:$0xff]   ;;  %v2503_v46 = vld [vmem:[#allocation8 + $0x8] ss:$16 sps:$4 sm:$0xff]  }
  0xf3   :  { %1378 = vmatpush1.bf16.msra.mxu0 %v3148_v60  ;;  %1501 = vmatpush1.bf16.msra.mxu1 %v3150_v41  ;;  %v2509_v41 = vld [vmem:[#allocation8 + $0x4c] ss:$16 sps:$4 sm:$0xff]   ;;  %v2515_v60 = vld [vmem:[#allocation8 + $0x68] ss:$16 sps:$4 sm:$0xff]  }
  0xf4   :  { %1591 = vmatprep.subr.bf16.mxu0 %v2500_v40  ;;  %1714 = vmatprep.subr.bf16.mxu1 %v2501_v13  ;;  %v2506_v40 = vld [vmem:[#allocation8 + $0x20] ss:$16 sps:$4 sm:$0xff]   ;;  %v2507_v13 = vld [vmem:[#allocation8 + $0x28] ss:$16 sps:$4 sm:$0xff]  }
  0xf6   :  { %1380 = vmatmul.mubr.bf16.vlgmr.msra.gmra.mrb[0].mxu0 %v282_v44  ;;  %1503 = vmatmul.mubr.bf16.vlgmr.msra.gmra.mrb[0].mxu1 %v282_v44  ;;  %v2510_v44 = vld [vmem:[#allocation8 + $0x40] ss:$16 sps:$4 sm:$0xff]  }
  0xf7   :  { %1592 = vmatpush1.bf16.msra.mxu0 %v2502_v54  ;;  %1715 = vmatpush1.bf16.msra.mxu1 %v2503_v46  ;;  %v2511_v54 = vld [vmem:[#allocation8 + $0x48] ss:$16 sps:$4 sm:$0xff]   ;;  %v2512_v46 = vld [vmem:[#allocation8 + $0x64] ss:$16 sps:$4 sm:$0xff]  }
  0xf8   :  { %1593 = vmatprep.subr.bf16.mxu0 %v2504_v52  ;;  %1716 = vmatprep.subr.bf16.mxu1 %v2505_v45  ;;  %v2513_v52 = vld [vmem:[#allocation8 + $0x6c] ss:$16 sps:$4 sm:$0xff]   ;;  %v2514_v45 = vld [vmem:[#allocation8 + $0x60] ss:$16 sps:$4 sm:$0xff]  }
  0xf9   :  { %1623 = vmatprep.mubr.bf16.mxu0 %v3161_v43  ;;  %1746 = vmatprep.mubr.bf16.mxu1 %v3161_v43 }
  0xfb   :  { %1594 = vmatpush1.bf16.msra.mxu0 %v2506_v40  ;;  %1717 = vmatpush1.bf16.msra.mxu1 %v2507_v13  ;;  %v2517_v40 = vld [vmem:[#allocation8 + $0x8c] ss:$16 sps:$4 sm:$0xff]   ;;  %v2518_v13 = vld [vmem:[#allocation8 + $0x80] ss:$16 sps:$4 sm:$0xff]  }
  0xfc   :  { %1595 = vmatprep.subr.bf16.mxu0 %v2508_v42  ;;  %1718 = vmatprep.subr.bf16.mxu1 %v2509_v41  ;;  %v2519_v42 = vld [vmem:[#allocation8 + $0x88] ss:$16 sps:$4 sm:$0xff]   ;;  %v2520_v41 = vld [vmem:[#allocation8 + $0xa4] ss:$16 sps:$4 sm:$0xff]  }
  0xff   :  { %1596 = vmatpush1.bf16.msra.mxu0 %v2510_v44  ;;  %1719 = vmatpush1.bf16.msra.mxu1 %v2511_v54  ;;  %v2521_v44 = vld [vmem:[#allocation8 + $0xac] ss:$16 sps:$4 sm:$0xff]   ;;  %v2522_v54 = vld [vmem:[#allocation8 + $0xa0] ss:$16 sps:$4 sm:$0xff]  }
 0x100   :  { %1597 = vmatprep.subr.bf16.mxu0 %v2512_v46  ;;  %1720 = vmatprep.subr.bf16.mxu1 %v2513_v52  ;;  %v2523_v46 = vld [vmem:[#allocation8 + $0xa8] ss:$16 sps:$4 sm:$0xff]   ;;  %v2524_v52 = vld [vmem:[#allocation8 + $0xc4] ss:$16 sps:$4 sm:$0xff]  }
 0x103   :  { %1598 = vmatpush1.bf16.msra.mxu0 %v2514_v45  ;;  %1721 = vmatpush1.bf16.msra.mxu1 %v2515_v60  ;;  %v2525_v45 = vld [vmem:[#allocation8 + $0xcc] ss:$16 sps:$4 sm:$0xff]   ;;  %v2526_v60 = vld [vmem:[#allocation8 + $0xc0] ss:$16 sps:$4 sm:$0xff]  }
 0x104   :  { %1599 = vmatprep.subr.bf16.mxu0 %v2516_v58  ;;  %1722 = vmatprep.subr.bf16.mxu1 %v2517_v40  ;;  %v2527_v58 = vld [vmem:[#allocation8 + $0xc8] ss:$16 sps:$4 sm:$0xff]   ;;  %v2528_v40 = vld [vmem:[#allocation8 + $0xe4] ss:$16 sps:$4 sm:$0xff]  }
 0x107   :  { %1600 = vmatpush1.bf16.msra.mxu0 %v2518_v13  ;;  %1723 = vmatpush1.bf16.msra.mxu1 %v2519_v42  ;;  %v2529_v13 = vld [vmem:[#allocation8 + $0xec] ss:$16 sps:$4 sm:$0xff]   ;;  %v2530_v42 = vld [vmem:[#allocation8 + $0xe0] ss:$16 sps:$4 sm:$0xff]  }
 0x108   :  { %1601 = vmatprep.subr.bf16.mxu0 %v2520_v41  ;;  %1724 = vmatprep.subr.bf16.mxu1 %v2521_v44  ;;  %v2531_v41 = vld [vmem:[#allocation8 + $0xe8] ss:$16 sps:$4 sm:$0xff]   ;;  %v2532_v44 = vld [vmem:[#allocation8 + $0x104] ss:$16 sps:$4 sm:$0xff]  }
 0x10b   :  { %1602 = vmatpush1.bf16.msra.mxu0 %v2522_v54  ;;  %1725 = vmatpush1.bf16.msra.mxu1 %v2523_v46  ;;  %v2533_v54 = vld [vmem:[#allocation8 + $0x10c] ss:$16 sps:$4 sm:$0xff]   ;;  %v2534_v46 = vld [vmem:[#allocation8 + $0x100] ss:$16 sps:$4 sm:$0xff]  }
 0x10c   :  { %1603 = vmatprep.subr.bf16.mxu0 %v2524_v52  ;;  %1726 = vmatprep.subr.bf16.mxu1 %v2525_v45  ;;  %v2535_v52 = vld [vmem:[#allocation8 + $0x108] ss:$16 sps:$4 sm:$0xff]   ;;  %v2536_v45 = vld [vmem:[#allocation8 + $0x124] ss:$16 sps:$4 sm:$0xff]  }
 0x10f   :  { %1604 = vmatpush1.bf16.msra.mxu0 %v2526_v60  ;;  %1727 = vmatpush1.bf16.msra.mxu1 %v2527_v58  ;;  %v2537_v60 = vld [vmem:[#allocation8 + $0x12c] ss:$16 sps:$4 sm:$0xff]   ;;  %v2538_v58 = vld [vmem:[#allocation8 + $0x120] ss:$16 sps:$4 sm:$0xff]  }
 0x110   :  { %1605 = vmatprep.subr.bf16.mxu0 %v2528_v40  ;;  %1728 = vmatprep.subr.bf16.mxu1 %v2529_v13  ;;  %v2539_v40 = vld [vmem:[#allocation8 + $0x128] ss:$16 sps:$4 sm:$0xff]   ;;  %v2540_v13 = vld [vmem:[#allocation8 + $0x144] ss:$16 sps:$4 sm:$0xff]  }
 0x113   :  { %1606 = vmatpush1.bf16.msra.mxu0 %v2530_v42  ;;  %1729 = vmatpush1.bf16.msra.mxu1 %v2531_v41  ;;  %v2541_v42 = vld [vmem:[#allocation8 + $0x14c] ss:$16 sps:$4 sm:$0xff]  }
 0x114   :  { %1607 = vmatprep.subr.bf16.mxu0 %v2532_v44  ;;  %1730 = vmatprep.subr.bf16.mxu1 %v2533_v54  ;;  %v3604_v41 = vld [vmem:[#allocation56_spill] sm:$0xff]  ;;  %v3605_v44 = vld [vmem:[#allocation57_spill] sm:$0xff]  ;;  %v3606_v54 = vld [vmem:[#allocation58_spill] sm:$0xff] }
 0x117   :  { %1608 = vmatpush1.bf16.msra.mxu0 %v2534_v46  ;;  %1731 = vmatpush1.bf16.msra.mxu1 %v2535_v52  ;;  %v3607_v46 = vld [vmem:[#allocation59_spill] sm:$0xff]  ;;  %v3608_v52 = vld [vmem:[#allocation60_spill] sm:$0xff] }
 0x118   :  { %1609 = vmatprep.subr.bf16.mxu0 %v2536_v45  ;;  %1732 = vmatprep.subr.bf16.mxu1 %v2537_v60  ;;  %v3609_v45 = vld [vmem:[#allocation61_spill] sm:$0xff]  ;;  %v3610_v60 = vld [vmem:[#allocation62_spill] sm:$0xff] }
 0x11b   :  { %1610 = vmatpush1.bf16.msra.mxu0 %v2538_v58  ;;  %1733 = vmatpush1.bf16.msra.mxu1 %v2539_v40  ;;  %v3611_v58 = vld [vmem:[#allocation63_spill] sm:$0xff]  ;;  %v3612_v40 = vld [vmem:[#allocation64_spill] sm:$0xff] }
 0x11c   :  { %1611 = vmatprep.subr.bf16.mxu0 %v2540_v13  ;;  %1734 = vmatprep.subr.bf16.mxu1 %v2541_v42  ;;  %v3613_v13 = vld [vmem:[#allocation65_spill] sm:$0xff]  ;;  %v3614_v42 = vld [vmem:[#allocation66_spill] sm:$0xff] }
 0x11f   :  { %1612 = vmatpush1.bf16.msra.mxu0 %v2677_v47  ;;  %1735 = vmatpush1.bf16.msra.mxu1 %v2679_v48  ;;  %v3187_v47 = vrot.slane %v3144_v17, %v2682_v49  ;;  %v1584_v48 = vcombine.high %v3161_v43, %v3161_v43  ;;  %v3559_v43 = vld [vmem:[#allocation12_spill] sm:$0xff]  ;;  %v3603_v17 = vld [vmem:[#allocation55_spill] sm:$0xff] }
 0x120   :  { %1613 = vmatprep.subr.bf16.mxu0 %v2684_v50  ;;  %1736 = vmatprep.subr.bf16.mxu1 %v2686_v51  ;;  %v3560_v50 = vld [vmem:[#allocation13_spill] sm:$0xff]  ;;  %v3561_v51 = vld [vmem:[#allocation14_spill] sm:$0xff] }
 0x123   :  { %1614 = vmatpush1.bf16.msra.mxu0 %v2690_v53  ;;  %1737 = vmatpush1.bf16.msra.mxu1 %v2696_v55  ;;  %v3562_v53 = vld [vmem:[#allocation15_spill] sm:$0xff]  ;;  %v3563_v55 = vld [vmem:[#allocation16_spill] sm:$0xff] }
 0x124   :  { %1615 = vmatprep.subr.bf16.mxu0 %v2700_v56  ;;  %1738 = vmatprep.subr.bf16.mxu1 %v2702_v57  ;;  %v3564_v56 = vld [vmem:[#allocation17_spill] sm:$0xff]  ;;  %v3565_v57 = vld [vmem:[#allocation18_spill] sm:$0xff] }
 0x127   :  { %1616 = vmatpush1.bf16.msra.mxu0 %v2704_v59  ;;  %1739 = vmatpush1.bf16.msra.mxu1 %v2709_v61  ;;  %v3566_v59 = vld [vmem:[#allocation19_spill] sm:$0xff]  ;;  %v3567_v61 = vld [vmem:[#allocation20_spill] sm:$0xff] }
 0x128   :  { %1617 = vmatprep.subr.bf16.mxu0 %v2713_v62  ;;  %1740 = vmatprep.subr.bf16.mxu1 %v2715_v63  ;;  %v3568_v62 = vld [vmem:[#allocation21_spill] sm:$0xff]  ;;  %v3569_v63 = vld [vmem:[#allocation22_spill] sm:$0xff] }
 0x12b   :  { %1618 = vmatpush1.bf16.msra.mxu0 %v2717_v0  ;;  %1741 = vmatpush1.bf16.msra.mxu1 %v2721_v1  ;;  %v3570_v0 = vld [vmem:[#allocation23_spill] sm:$0xff]  ;;  %v3571_v1 = vld [vmem:[#allocation24_spill] sm:$0xff] }
 0x12c   :  { %1619 = vmatprep.subr.bf16.mxu0 %v2725_v2  ;;  %1742 = vmatprep.subr.bf16.mxu1 %v2727_v3  ;;  %v3572_v2 = vld [vmem:[#allocation25_spill] sm:$0xff]  ;;  %v3573_v3 = vld [vmem:[#allocation26_spill] sm:$0xff] }
 0x12f   :  { %1620 = vmatpush1.bf16.msra.mxu0 %v2729_v4  ;;  %1743 = vmatpush1.bf16.msra.mxu1 %v2733_v5  ;;  %v3574_v4 = vld [vmem:[#allocation27_spill] sm:$0xff]  ;;  %v3575_v5 = vld [vmem:[#allocation28_spill] sm:$0xff] }
 0x130   :  { %1621 = vmatprep.subr.bf16.mxu0 %v2737_v6  ;;  %1744 = vmatprep.subr.bf16.mxu1 %v2739_v7  ;;  %v3576_v6 = vld [vmem:[#allocation29_spill] sm:$0xff]  ;;  %v3577_v7 = vld [vmem:[#allocation30_spill] sm:$0xff] }
 0x133   :  { %1622 = vmatpush1.bf16.msra.mxu0 %v2741_v8  ;;  %1745 = vmatpush1.bf16.msra.mxu1 %v2745_v9  ;;  %v3578_v8 = vld [vmem:[#allocation31_spill] sm:$0xff]  ;;  %v3579_v9 = vld [vmem:[#allocation32_spill] sm:$0xff] }
 0x134   :  { %1632 = vmatprep.subr.bf16.mxu0 %v2749_v10  ;;  %1755 = vmatprep.subr.bf16.mxu1 %v2751_v11  ;;  %v3580_v10 = vld [vmem:[#allocation33_spill] sm:$0xff]  ;;  %v3581_v11 = vld [vmem:[#allocation34_spill] sm:$0xff] }
 0x136   :  { %1624 = vmatmul.mubr.bf16.vlgmr.msra.gmra.mrb[4].mxu0 %v3187_v47  ;;  %1747 = vmatmul.mubr.bf16.vlgmr.msra.gmra.mrb[4].mxu1 %v3187_v47 }
 0x137   :  { %1633 = vmatpush1.bf16.msra.mxu0 %v2753_v12  ;;  %1756 = vmatpush1.bf16.msra.mxu1 %v2760_v14  ;;  %v3582_v12 = vld [vmem:[#allocation35_spill] sm:$0xff]  ;;  %v3583_v14 = vld [vmem:[#allocation36_spill] sm:$0xff] }
 0x138   :  { %1634 = vmatprep.subr.bf16.mxu0 %v2764_v15  ;;  %1757 = vmatprep.subr.bf16.mxu1 %v2766_v16  ;;  %v3584_v15 = vld [vmem:[#allocation37_spill] sm:$0xff]  ;;  %v3585_v16 = vld [vmem:[#allocation106_spill] sm:$0xff] }
 0x139   :  { %1664 = vmatprep.mubr.bf16.mxu0 %v1584_v48  ;;  %1787 = vmatprep.mubr.bf16.mxu1 %v1584_v48  ;;  %v3616_v48 = vld [vmem:[#allocation68_spill] sm:$0xff] }
 0x13b   :  { %1635 = vmatpush1.bf16.msra.mxu0 %v2770_v18  ;;  %1758 = vmatpush1.bf16.msra.mxu1 %v2774_v19  ;;  %v1538_v18 = vcombine.high %v3585_v16, %v3585_v16  ;;  %v3586_v19 = vld [vmem:[#allocation38_spill] sm:$0xff]  ;;  %v3643_v16 = vld [vmem:[#allocation95_spill] sm:$0xff] }
 0x13c   :  { %1636 = vmatprep.subr.bf16.mxu0 %v2778_v20  ;;  %1759 = vmatprep.subr.bf16.mxu1 %v2780_v21  ;;  %v3587_v20 = vld [vmem:[#allocation39_spill] sm:$0xff]  ;;  %v3588_v21 = vld [vmem:[#allocation40_spill] sm:$0xff] }
 0x13f   :  { %1637 = vmatpush1.bf16.msra.mxu0 %v2782_v22  ;;  %1760 = vmatpush1.bf16.msra.mxu1 %v2786_v23  ;;  %v3589_v22 = vld [vmem:[#allocation41_spill] sm:$0xff]  ;;  %v3256_v23 = vrot.slane %v1538_v18, %v2682_v49  ;;  %v3644_v18 = vld [vmem:[#allocation96_spill] sm:$0xff] }
 0x140   :  { %1638 = vmatprep.subr.bf16.mxu0 %v2790_v24  ;;  %1761 = vmatprep.subr.bf16.mxu1 %v2792_v25  ;;  %v3590_v24 = vld [vmem:[#allocation42_spill] sm:$0xff]  ;;  %v3591_v25 = vld [vmem:[#allocation43_spill] sm:$0xff] }
 0x143   :  { %1639 = vmatpush1.bf16.msra.mxu0 %v2794_v26  ;;  %1762 = vmatpush1.bf16.msra.mxu1 %v2798_v27  ;;  %v3592_v26 = vld [vmem:[#allocation44_spill] sm:$0xff]  ;;  %v3593_v27 = vld [vmem:[#allocation45_spill] sm:$0xff] }
 0x144   :  { %1640 = vmatprep.subr.bf16.mxu0 %v2802_v28  ;;  %1763 = vmatprep.subr.bf16.mxu1 %v2804_v29  ;;  %v1554_v28 = vcombine.high %v3256_v23, %v3256_v23  ;;  %v1583_v29 = vcombine.high %v3187_v47, %v3187_v47  ;;  %v3615_v47 = vld [vmem:[#allocation67_spill] sm:$0xff] }
 0x147   :  { %1641 = vmatpush1.bf16.msra.mxu0 %v2806_v30  ;;  %1764 = vmatpush1.bf16.msra.mxu1 %v2810_v31  ;;  %v3594_v30 = vld [vmem:[#allocation46_spill] sm:$0xff]  ;;  %v3595_v31 = vld [vmem:[#allocation47_spill] sm:$0xff] }
 0x148   :  { %1642 = vmatprep.subr.bf16.mxu0 %v2814_v32  ;;  %1765 = vmatprep.subr.bf16.mxu1 %v2816_v33  ;;  %v3596_v32 = vld [vmem:[#allocation48_spill] sm:$0xff]  ;;  %v3597_v33 = vld [vmem:[#allocation49_spill] sm:$0xff] }
 0x14b   :  { %1643 = vmatpush1.bf16.msra.mxu0 %v2818_v34  ;;  %1766 = vmatpush1.bf16.msra.mxu1 %v2822_v35  ;;  %v1582_v34 = vrot.slane %v1554_v28, %v2682_v49  ;;  %v3598_v35 = vld [vmem:[#allocation50_spill] sm:$0xff]  ;;  %v3653_v28 = vld [vmem:[#allocation105_spill] sm:$0xff] }
 0x14c   :  { %1644 = vmatprep.subr.bf16.mxu0 %v2826_v36  ;;  %1767 = vmatprep.subr.bf16.mxu1 %v2828_v37  ;;  %v3599_v36 = vld [vmem:[#allocation51_spill] sm:$0xff]  ;;  %v3600_v37 = vld [vmem:[#allocation52_spill] sm:$0xff] }
 0x14f   :  { %1645 = vmatpush1.bf16.msra.mxu0 %v2830_v38  ;;  %1768 = vmatpush1.bf16.msra.mxu1 %v2834_v39  ;;  %v3601_v38 = vld [vmem:[#allocation53_spill] sm:$0xff]  ;;  %v3602_v39 = vld [vmem:[#allocation54_spill] sm:$0xff] }
 0x150   :  { %1646 = vmatprep.subr.bf16.mxu0 %v3559_v43  ;;  %1769 = vmatprep.subr.bf16.mxu1 %v3560_v50  ;;  %v3617_v43 = vld [vmem:[#allocation69_spill] sm:$0xff]  ;;  %v3618_v50 = vld [vmem:[#allocation70_spill] sm:$0xff] }
 0x153   :  { %1647 = vmatpush1.bf16.msra.mxu0 %v3561_v51  ;;  %1770 = vmatpush1.bf16.msra.mxu1 %v3562_v53  ;;  %v3619_v51 = vld [vmem:[#allocation71_spill] sm:$0xff]  ;;  %v3620_v53 = vld [vmem:[#allocation72_spill] sm:$0xff] }
 0x154   :  { %1648 = vmatprep.subr.bf16.mxu0 %v3563_v55  ;;  %1771 = vmatprep.subr.bf16.mxu1 %v3564_v56  ;;  %v3621_v55 = vld [vmem:[#allocation73_spill] sm:$0xff]  ;;  %v3622_v56 = vld [vmem:[#allocation74_spill] sm:$0xff] }
 0x157   :  { %1649 = vmatpush1.bf16.msra.mxu0 %v3565_v57  ;;  %1772 = vmatpush1.bf16.msra.mxu1 %v3566_v59  ;;  %v3623_v57 = vld [vmem:[#allocation75_spill] sm:$0xff]  ;;  %v3624_v59 = vld [vmem:[#allocation76_spill] sm:$0xff] }
 0x158   :  { %1650 = vmatprep.subr.bf16.mxu0 %v3567_v61  ;;  %1773 = vmatprep.subr.bf16.mxu1 %v3568_v62  ;;  %v3625_v61 = vld [vmem:[#allocation77_spill] sm:$0xff]  ;;  %v3626_v62 = vld [vmem:[#allocation78_spill] sm:$0xff] }
 0x15b   :  { %1651 = vmatpush1.bf16.msra.mxu0 %v3569_v63  ;;  %1774 = vmatpush1.bf16.msra.mxu1 %v3570_v0  ;;  %v3627_v63 = vld [vmem:[#allocation79_spill] sm:$0xff]  ;;  %v3628_v0 = vld [vmem:[#allocation80_spill] sm:$0xff] }
 0x15c   :  { %1652 = vmatprep.subr.bf16.mxu0 %v3571_v1  ;;  %1775 = vmatprep.subr.bf16.mxu1 %v3572_v2  ;;  %v3629_v1 = vld [vmem:[#allocation81_spill] sm:$0xff]  ;;  %v3630_v2 = vld [vmem:[#allocation82_spill] sm:$0xff] }
 0x15f   :  { %1653 = vmatpush1.bf16.msra.mxu0 %v3573_v3  ;;  %1776 = vmatpush1.bf16.msra.mxu1 %v3574_v4  ;;  %v3631_v3 = vld [vmem:[#allocation83_spill] sm:$0xff]  ;;  %v3632_v4 = vld [vmem:[#allocation84_spill] sm:$0xff] }
 0x160   :  { %1654 = vmatprep.subr.bf16.mxu0 %v3575_v5  ;;  %1777 = vmatprep.subr.bf16.mxu1 %v3576_v6  ;;  %v3633_v5 = vld [vmem:[#allocation85_spill] sm:$0xff]  ;;  %v3634_v6 = vld [vmem:[#allocation86_spill] sm:$0xff] }
 0x163   :  { %1655 = vmatpush1.bf16.msra.mxu0 %v3577_v7  ;;  %1778 = vmatpush1.bf16.msra.mxu1 %v3578_v8  ;;  %v3635_v7 = vld [vmem:[#allocation87_spill] sm:$0xff]  ;;  %v3636_v8 = vld [vmem:[#allocation88_spill] sm:$0xff] }
 0x164   :  { %1656 = vmatprep.subr.bf16.mxu0 %v3579_v9  ;;  %1779 = vmatprep.subr.bf16.mxu1 %v3580_v10  ;;  %v3637_v9 = vld [vmem:[#allocation89_spill] sm:$0xff]  ;;  %v3638_v10 = vld [vmem:[#allocation90_spill] sm:$0xff] }
 0x167   :  { %1657 = vmatpush1.bf16.msra.mxu0 %v3581_v11  ;;  %1780 = vmatpush1.bf16.msra.mxu1 %v3582_v12  ;;  %v3639_v11 = vld [vmem:[#allocation91_spill] sm:$0xff]  ;;  %v3640_v12 = vld [vmem:[#allocation92_spill] sm:$0xff] }
 0x168   :  { %1658 = vmatprep.subr.bf16.mxu0 %v3583_v14  ;;  %1781 = vmatprep.subr.bf16.mxu1 %v3584_v15  ;;  %v3641_v14 = vld [vmem:[#allocation93_spill] sm:$0xff]  ;;  %v3642_v15 = vld [vmem:[#allocation94_spill] sm:$0xff] }
 0x16b   :  { %1659 = vmatpush1.bf16.msra.mxu0 %v3586_v19  ;;  %1782 = vmatpush1.bf16.msra.mxu1 %v3587_v20  ;;  %v3645_v19 = vld [vmem:[#allocation97_spill] sm:$0xff]  ;;  %v3646_v20 = vld [vmem:[#allocation98_spill] sm:$0xff] }
 0x16c   :  { %1660 = vmatprep.subr.bf16.mxu0 %v3588_v21  ;;  %1783 = vmatprep.subr.bf16.mxu1 %v3589_v22  ;;  %v3647_v21 = vld [vmem:[#allocation99_spill] sm:$0xff]  ;;  %v3648_v22 = vld [vmem:[#allocation100_spill] sm:$0xff] }
 0x16f   :  { %1661 = vmatpush1.bf16.msra.mxu0 %v3590_v24  ;;  %1784 = vmatpush1.bf16.msra.mxu1 %v3591_v25  ;;  %v3649_v24 = vld [vmem:[#allocation101_spill] sm:$0xff]  ;;  %v3650_v25 = vld [vmem:[#allocation102_spill] sm:$0xff] }
 0x170   :  { %1662 = vmatprep.subr.bf16.mxu0 %v3592_v26  ;;  %1785 = vmatprep.subr.bf16.mxu1 %v3593_v27  ;;  %v3651_v26 = vld [vmem:[#allocation103_spill] sm:$0xff]  ;;  %v3652_v27 = vld [vmem:[#allocation104_spill] sm:$0xff] }
 0x173   :  { %1663 = vmatpush1.bf16.msra.mxu0 %v3594_v30  ;;  %1786 = vmatpush1.bf16.msra.mxu1 %v3595_v31  ;;  %v3655_v30 = vld [vmem:[#allocation108_spill] sm:$0xff]  ;;  %v3656_v31 = vld [vmem:[#allocation109_spill] sm:$0xff] }
 0x174   :  { %1673 = vmatprep.subr.bf16.mxu0 %v3596_v32  ;;  %1796 = vmatprep.subr.bf16.mxu1 %v3597_v33  ;;  %v3657_v32 = vld [vmem:[#allocation110_spill] sm:$0xff]  ;;  %v1568_v33 = vrot.slane %v3256_v23, %v2682_v49 }
 0x176   :  { %1665 = vmatmul.mubr.bf16.vlgmr.msra.gmra.mrb[4].mxu0 %v1583_v29  ;;  %1788 = vmatmul.mubr.bf16.vlgmr.msra.gmra.mrb[4].mxu1 %v1583_v29  ;;  %v3654_v29 = vld [vmem:[#allocation107_spill] sm:$0xff] }
 0x177   :  { %1674 = vmatpush1.bf16.msra.mxu0 %v3598_v35  ;;  %1797 = vmatpush1.bf16.msra.mxu1 %v3599_v36  ;;  %v3659_v35 = vld [vmem:[#allocation112_spill] sm:$0xff]  ;;  %v2618_v36 = vmov 1983009808  }
 0x178   :  { %1675 = vmatprep.subr.bf16.mxu0 %v3600_v37  ;;  %1798 = vmatprep.subr.bf16.mxu1 %v3601_v38  ;;  %v1518_v37 = vunpack.c.l.s4 %v2618_v36 }
 0x179   :  { %1705 = vmatprep.mubr.bf16.mxu0 %v1582_v34  ;;  %1828 = vmatprep.mubr.bf16.mxu1 %v1582_v34  ;;  %v3658_v34 = vld [vmem:[#allocation111_spill] sm:$0xff] }
 0x17a   :  { %v1519_v38 = vunpack.c.0.s8 %v1518_v37 }
 0x17b   :  { %1676 = vmatpush1.bf16.msra.mxu0 %v3602_v39  ;;  %1799 = vmatpush1.bf16.msra.mxu1 %v3603_v17 }
 0x17c   :  { %1677 = vmatprep.subr.bf16.mxu0 %v3604_v41  ;;  %1800 = vmatprep.subr.bf16.mxu1 %v3605_v44  ;;  %v3660_v41 = vld [vmem:[#allocation11_spill] sm:$0xff] }
 0x17d   :  { %v1522_v44 = vsub.s32 %v1519_v38, %v3660_v41 }
 0x17f   :  { %1678 = vmatpush1.bf16.msra.mxu0 %v3606_v54  ;;  %1801 = vmatpush1.bf16.msra.mxu1 %v3607_v46 }
 0x180   :  { %1679 = vmatprep.subr.bf16.mxu0 %v3608_v52  ;;  %1802 = vmatprep.subr.bf16.mxu1 %v3609_v45 }
 0x183   :  { %1680 = vmatpush1.bf16.msra.mxu0 %v3610_v60  ;;  %1803 = vmatpush1.bf16.msra.mxu1 %v3611_v58 }
 0x184   :  { %1681 = vmatprep.subr.bf16.mxu0 %v3612_v40  ;;  %1804 = vmatprep.subr.bf16.mxu1 %v3613_v13 }
 0x187   :  { %1682 = vmatpush1.bf16.msra.mxu0 %v3614_v42  ;;  %1805 = vmatpush1.bf16.msra.mxu1 %v3615_v47 }
 0x188   :  { %1683 = vmatprep.subr.bf16.mxu0 %v3616_v48  ;;  %1806 = vmatprep.subr.bf16.mxu1 %v3617_v43 }
 0x18b   :  { %1684 = vmatpush1.bf16.msra.mxu0 %v3618_v50  ;;  %1807 = vmatpush1.bf16.msra.mxu1 %v3619_v51 }
 0x18c   :  { %1685 = vmatprep.subr.bf16.mxu0 %v3620_v53  ;;  %1808 = vmatprep.subr.bf16.mxu1 %v3621_v55 }
 0x18f   :  { %1686 = vmatpush1.bf16.msra.mxu0 %v3622_v56  ;;  %1809 = vmatpush1.bf16.msra.mxu1 %v3623_v57 }
 0x190   :  { %1687 = vmatprep.subr.bf16.mxu0 %v3624_v59  ;;  %1810 = vmatprep.subr.bf16.mxu1 %v3625_v61 }
 0x193   :  { %1688 = vmatpush1.bf16.msra.mxu0 %v3626_v62  ;;  %1811 = vmatpush1.bf16.msra.mxu1 %v3627_v63 }
 0x194   :  { %1689 = vmatprep.subr.bf16.mxu0 %v3628_v0  ;;  %1812 = vmatprep.subr.bf16.mxu1 %v3629_v1 }
 0x197   :  { %1690 = vmatpush1.bf16.msra.mxu0 %v3630_v2  ;;  %1813 = vmatpush1.bf16.msra.mxu1 %v3631_v3 }
 0x198   :  { %1691 = vmatprep.subr.bf16.mxu0 %v3632_v4  ;;  %1814 = vmatprep.subr.bf16.mxu1 %v3633_v5 }
 0x19b   :  { %1692 = vmatpush1.bf16.msra.mxu0 %v3634_v6  ;;  %1815 = vmatpush1.bf16.msra.mxu1 %v3635_v7 }
 0x19c   :  { %1693 = vmatprep.subr.bf16.mxu0 %v3636_v8  ;;  %1816 = vmatprep.subr.bf16.mxu1 %v3637_v9 }
 0x19f   :  { %1694 = vmatpush1.bf16.msra.mxu0 %v3638_v10  ;;  %1817 = vmatpush1.bf16.msra.mxu1 %v3639_v11 }
 0x1a0   :  { %1695 = vmatprep.subr.bf16.mxu0 %v3640_v12  ;;  %1818 = vmatprep.subr.bf16.mxu1 %v3641_v14 }
 0x1a3   :  { %1696 = vmatpush1.bf16.msra.mxu0 %v3642_v15  ;;  %1819 = vmatpush1.bf16.msra.mxu1 %v3643_v16 }
 0x1a4   :  { %1697 = vmatprep.subr.bf16.mxu0 %v3644_v18  ;;  %1820 = vmatprep.subr.bf16.mxu1 %v3645_v19 }
 0x1a7   :  { %1698 = vmatpush1.bf16.msra.mxu0 %v3646_v20  ;;  %1821 = vmatpush1.bf16.msra.mxu1 %v3647_v21 }
 0x1a8   :  { %1699 = vmatprep.subr.bf16.mxu0 %v3648_v22  ;;  %1822 = vmatprep.subr.bf16.mxu1 %v3649_v24 }
 0x1ab   :  { %1700 = vmatpush1.bf16.msra.mxu0 %v3650_v25  ;;  %1823 = vmatpush1.bf16.msra.mxu1 %v3651_v26 }
 0x1ac   :  { %1701 = vmatprep.subr.bf16.mxu0 %v3652_v27  ;;  %1824 = vmatprep.subr.bf16.mxu1 %v3653_v28 }
 0x1af   :  { %1702 = vmatpush1.bf16.msra.mxu0 %v3654_v29  ;;  %1825 = vmatpush1.bf16.msra.mxu1 %v3655_v30 }
 0x1b0   :  { %1703 = vmatprep.subr.bf16.mxu0 %v3656_v31  ;;  %1826 = vmatprep.subr.bf16.mxu1 %v3657_v32 }
 0x1b3   :  { %1704 = vmatpush1.bf16.msra.mxu0 %v3658_v34  ;;  %1827 = vmatpush1.bf16.msra.mxu1 %v3659_v35 }
 0x1b6   :  { %1706 = vmatmul.mubr.bf16.vlgmr.msra.gmra.mrb[4].mxu0 %v1568_v33  ;;  %1829 = vmatmul.mubr.bf16.vlgmr.msra.gmra.mrb[4].mxu1 %v1568_v33 }
 0x1c9   :  { %v1381_v39 = vpop.f32.mrb[0].mxu0  ;;  %v1504_v17 = vpop.f32.mrb[0].mxu1 }
 0x1ca   :  { %v1383_v54 = vpop.f32.mrb[1].mxu0  ;;  %v1506_v46 = vpop.f32.mrb[1].mxu1 }
 0x1cb   :  { %v1515_v52 = vcombine.low %v1381_v39, %v1383_v54  ;;  %v1516_v45 = vcombine.low %v1504_v17, %v1506_v46  ;;  %v1385_v60 = vpop.f32.mrb[2].mxu0  ;;  %v1508_v58 = vpop.f32.mrb[2].mxu1 }
 0x1cc   :  { %v1386_v49 = vpop.f32.mrb[3].mxu0  ;;  %v1509_v23 = vpop.f32.mrb[3].mxu1 }
 0x1cd   :  { %v1523_v40 = vrot.slane %v1515_v52, %v1522_v44  ;;  %v1530_v13 = vrot.slane %v1516_v45, %v1522_v44 }
 0x1cf   :  { %v1531_v42 = vcombine.low %v1523_v40, %v1530_v13 }
 0x1d1   :  { %v1899_v47 = vmul.f32 %v1531_v42, %v1531_v42 }
 0x1d3   :  { %v1901_v48 = vcombine.high %v1899_v47, %v1899_v47  ;;  %v1908_v43 = vrot.slane %v1899_v47, %v1522_v44 }
 0x1d5   :  { %v1915_v50 = vrot.slane %v1901_v48, %v1522_v44  ;;  %v1916_v51 = vcombine.high %v1908_v43, %v1908_v43  ;;  %v1922_v55 = vsel %vm1889_vm0, %v1908_v43, 0.0 }
 0x1d7   :  { %v1917_v53 = vcombine.high %v1915_v50, %v1915_v50  ;;  %v1923_v56 = vsel %vm1889_vm0, %v1916_v51, 0.0  ;;  %v1925_v59 = vsel %vm1889_vm0, %v1915_v50, 0.0 }
 0x1d8   :  { %v1924_v57 = vadd.f32 %v1923_v56, %v1922_v55 }
 0x1d9   :  { %v1927_v62 = vsel %vm1889_vm0, %v1917_v53, 0.0 }
 0x1da   :  { %v1926_v61 = vadd.f32 %v1925_v59, %v1924_v57 }
 0x1dc   :  { %v1928_v63 = vadd.f32 %v1927_v62, %v1926_v61 }
 0x1de   :  { %1929 = vadd.xlane.f32.xlu0 %v1928_v63 }
 0x289   :  { %v1707_v0 = vpop.f32.mrb[4].mxu0  ;;  %v1830_v1 = vpop.f32.mrb[4].mxu1 }
 0x28a   :  { %v1709_v2 = vpop.f32.mrb[5].mxu0  ;;  %v1832_v3 = vpop.f32.mrb[5].mxu1 }
 0x28b   :  { %v1841_v4 = vcombine.low %v1707_v0, %v1709_v2  ;;  %v1842_v5 = vcombine.low %v1830_v1, %v1832_v3  ;;  %v1711_v6 = vpop.f32.mrb[6].mxu0  ;;  %v1834_v7 = vpop.f32.mrb[6].mxu1 }
 0x28c   :  { %v1712_v8 = vpop.f32.mrb[7].mxu0  ;;  %v1835_v9 = vpop.f32.mrb[7].mxu1 }
 0x28d   :  { %v1849_v10 = vrot.slane %v1841_v4, %v1522_v44  ;;  %v1856_v11 = vrot.slane %v1842_v5, %v1522_v44 }
 0x28f   :  { %v1857_v12 = vcombine.low %v1849_v10, %v1856_v11 }
 0x291   :  { %v1866_v14 = vmul.f32 %v1857_v12, %v1531_v42  ;;  %v1931_v15 = vmul.f32 %v1857_v12, %v1857_v12 }
 0x293   :  { %v1933_v16 = vcombine.high %v1931_v15, %v1931_v15  ;;  %v1940_v18 = vrot.slane %v1931_v15, %v1522_v44  ;;  %v1868_v19 = vcombine.high %v1866_v14, %v1866_v14  ;;  %v1875_v20 = vrot.slane %v1866_v14, %v1522_v44 }
 0x295   :  { %v1947_v21 = vrot.slane %v1933_v16, %v1522_v44  ;;  %v1948_v22 = vcombine.high %v1940_v18, %v1940_v18  ;;  %v1882_v24 = vrot.slane %v1868_v19, %v1522_v44  ;;  %v1883_v25 = vcombine.high %v1875_v20, %v1875_v20  ;;  %v1930_v44 = vpop.xlane.xlu0 %1929 }
 0x296   :  { %v1954_v27 = vsel %vm1889_vm0, %v1940_v18, 0.0  ;;  %v1890_v31 = vsel %vm1889_vm0, %v1875_v20, 0.0  ;;  %v1963_v46 = vadd.f32 1e-12, %v1930_v44 }
 0x297   :  { %v1949_v26 = vcombine.high %v1947_v21, %v1947_v21  ;;  %v1955_v28 = vsel %vm1889_vm0, %v1948_v22, 0.0  ;;  %v1884_v30 = vcombine.high %v1882_v24, %v1882_v24  ;;  %v1891_v32 = vsel %vm1889_vm0, %v1883_v25, 0.0 }
 0x298   :  { %v1956_v29 = vadd.f32 %v1955_v28, %v1954_v27  ;;  %v1957_v33 = vsel %vm1889_vm0, %v1947_v21, 0.0  ;;  %v1892_v34 = vadd.f32 %v1891_v32, %v1890_v31  ;;  %v1893_v36 = vsel %vm1889_vm0, %v1882_v24, 0.0 }
 0x299   :  { %v1959_v37 = vsel %vm1889_vm0, %v1949_v26, 0.0  ;;  %v1895_v17 = vsel %vm1889_vm0, %v1884_v30, 0.0 }
 0x29a   :  { %v1958_v35 = vadd.f32 %v1957_v33, %v1956_v29  ;;  %v1894_v38 = vadd.f32 %v1893_v36, %v1892_v34 }
 0x29c   :  { %v1960_v39 = vadd.f32 %v1959_v37, %v1958_v35  ;;  %v1896_v41 = vadd.f32 %v1895_v17, %v1894_v38 }
 0x29e   :  { %1961 = vadd.xlane.f32.xlu0 %v1960_v39  ;;  %1897 = vadd.xlane.f32.xlu1 %v1896_v41 }
 0x32b   :  { %v1962_v54 = vpop.xlane.xlu0 %1961  ;;  %v1898_v58 = vpop.xlane.xlu1 %1897 }
 0x32c   :  { %v1964_v52 = vadd.f32 1e-12, %v1962_v54 }
 0x32e   :  { %v1965_v45 = vmul.f32 %v1964_v52, %v1963_v46 }
 0x330   :  { %2498 = vrsqrt.f32 %v1965_v45 }
 0x33a   :  { %v2499_v60 = vpop.eup %2498 }
 0x33b   :  { %v1967_v49 = vmul.f32 %v2499_v60, %v1898_v58 }
 0x33d   :  { %v1968_v23 = vsub.f32 1.0, %v1967_v49 }
 0x33f   :  { %1970 = vst.msk [vmem:[%s3354_s3] sm:$0x3] %vm1969_vm1, %v1968_v23 }
 0x340   :  { %1975 = vsyncpa [#allocation5], 1 }
 0x341   :  { %1976 = vsyncpa [#allocation7], 1 }

</bundles_post_ra>
